<compile_context>
chip_gen: v6e
topology: v6e:2x2x1
jax: 0.10.0
libtpu: 0.0.40
codegen_flags: <defaults>
</compile_context>

<pallas_src>
import functools

import jax
import jax.numpy as jnp
from jax import lax
from jax.experimental import pallas as pl
from jax.experimental.pallas import tpu as pltpu

EPS = 1e-5  # nn.BatchNorm2d default eps


def _device_defaults():
    """Per-generation VMEM scoped limit and row-tile cap."""
    kind = ""
    try:
        kind = jax.devices()[0].device_kind.lower()
    except Exception:  # pragma: no cover - e.g. interpret mode / no backend yet
        pass
    if "v6" in kind:
        # 128 MiB physical VMEM: raise the scoped limit and allow bigger tiles.
        return 64 * 1024 * 1024, 1024
    # v5e (keep raised 32 MiB vs 16 MiB default) and v7x (64 MiB physical).
    return 32 * 1024 * 1024, 512


VMEM_LIMIT, TILE_CAP = _device_defaults()


def _tile_rows(M, cap=TILE_CAP):
    """Largest row tile <= cap that keeps >= 2 grid steps; minimum 16 rows."""
    for t in (2048, 1024, 512, 256, 128, 64, 32, 16):
        if t <= cap and M >= 2 * t:
            return t
    return 16 if M >= 16 else 8


def _pick_th(Ho, Wo):
    """Output-row block (in image rows) for conv2: ~512 flattened rows per
    block, and >= 2 row blocks when the image allows it (v7x dual TC)."""
    th = max(1, 512 // max(Wo, 1))
    th = min(th, Ho)
    if Ho >= 2 and th == Ho:
        th = (Ho + 1) // 2
    return th


# ----------------------------------------------------------------------------
# Kernel A: stage 1.  a = relu(bn2(relu(bn1(x)) @ w1)).  Single output stream.
# ----------------------------------------------------------------------------
def _stage1_kernel(x_ref, s1_ref, b1_ref, w1_ref, s2_ref, b2_ref, a_ref):
    x = x_ref[...].astype(jnp.float32)
    h = jnp.maximum(x * s1_ref[...] + b1_ref[...], 0.0)            # relu(bn1(x))
    y = jnp.dot(h.astype(jnp.bfloat16), w1_ref[...],
                preferred_element_type=jnp.float32)
    y = jnp.maximum(y * s2_ref[...] + b2_ref[...], 0.0)            # relu(bn2(.))
    a_ref[...] = y.astype(a_ref.dtype)


def stage1(x_flat, s1, b1, w1_bf, s2, b2):
    M, Cin = x_flat.shape
    Cmid = w1_bf.shape[1]
    tile = _tile_rows(M)
    grid = (-(-M // tile),)
    return pl.pallas_call(
        _stage1_kernel,
        out_shape=jax.ShapeDtypeStruct((M, Cmid), jnp.bfloat16),
        grid=grid,
        in_specs=[
            pl.BlockSpec((tile, Cin), lambda i: (i, 0)),    # x rows
            pl.BlockSpec((1, Cin), lambda i: (0, 0)),       # bn1 scale
            pl.BlockSpec((1, Cin), lambda i: (0, 0)),       # bn1 bias
            pl.BlockSpec((Cin, Cmid), lambda i: (0, 0)),    # w1 (bf16)
            pl.BlockSpec((1, Cmid), lambda i: (0, 0)),      # bn2 scale
            pl.BlockSpec((1, Cmid), lambda i: (0, 0)),      # bn2 bias
        ],
        out_specs=pl.BlockSpec((tile, Cmid), lambda i: (i, 0)),
        compiler_params=pltpu.CompilerParams(
            dimension_semantics=("parallel",),
            vmem_limit_bytes=VMEM_LIMIT),
    )(x_flat, s1, b1, w1_bf, s2, b2)


# ----------------------------------------------------------------------------
# Kernel B: KxK stride-s conv + bn3 + relu.  The padded activation is a
# space-to-depth "phase" array (N, s*s, Hq, Wq, Cmid) so every tap is a
# contiguous slice.  The K^2 taps are stacked along the contraction dim and
# fed to the MXU as ONE (rows, K^2*Cmid) x (K^2*Cmid, Cmid) matmul.  The grid
# tiles output rows (bounded accumulator, pipelined phase slab per image).
# ----------------------------------------------------------------------------
def _conv2_kernel(p_ref, w2_ref, s3_ref, b3_ref, o_ref, *, K, stride, TH, Wo):
    Cmid = o_ref.shape[-1]
    r = pl.program_id(1)
    hq0 = r * TH
    taps = []
    for t in range(K * K):                       # unrolled: static tap offsets
        kh, kw = divmod(t, K)
        ph = (kh % stride) * stride + (kw % stride)
        dh, dw = kh // stride, kw // stride
        taps.append(p_ref[ph, pl.ds(hq0 + dh, TH), pl.ds(dw, Wo), :])
    x = jnp.concatenate(taps, axis=-1).reshape(TH * Wo, K * K * Cmid)
    y = jnp.dot(x, w2_ref[...], preferred_element_type=jnp.float32)
    y = jnp.maximum(y * s3_ref[...] + b3_ref[...], 0.0)
    o_ref[...] = y.reshape(TH, Wo, Cmid).astype(o_ref.dtype)


def conv2(phases, w2_stacked, s3, b3, *, K, stride, Ho, Wo, TH):
    N, S2, Hq, Wq, Cmid = phases.shape
    n_rb = -(-Ho // TH)
    out = pl.pallas_call(
        functools.partial(_conv2_kernel, K=K, stride=stride, TH=TH, Wo=Wo),
        out_shape=jax.ShapeDtypeStruct((N, Ho, Wo, Cmid), jnp.bfloat16),
        grid=(N, n_rb),
        in_specs=[
            pl.BlockSpec((None, S2, Hq, Wq, Cmid),
                         lambda n, r: (n, 0, 0, 0, 0)),   # phase slab (resident per n)
            pl.BlockSpec((K * K * Cmid, Cmid), lambda n, r: (0, 0)),  # stacked taps
            pl.BlockSpec((1, Cmid), lambda n, r: (0, 0)),             # bn3 scale
            pl.BlockSpec((1, Cmid), lambda n, r: (0, 0)),             # bn3 bias
        ],
        out_specs=pl.BlockSpec((None, TH, Wo, Cmid), lambda n, r: (n, r, 0, 0)),
        compiler_params=pltpu.CompilerParams(
            dimension_semantics=("parallel", "parallel"),
            vmem_limit_bytes=VMEM_LIMIT),
    )(phases, w2_stacked, s3, b3)
    return out.reshape(N * Ho * Wo, Cmid)


# ----------------------------------------------------------------------------
# Kernel C: conv3 (1x1) + residual.  Shortcut variant recomputes relu(bn1(x))
# in-kernel from the strided x rows (no h materialized in HBM); the two dots
# go back-to-back into one f32 accumulator.  Identity variant adds raw x.
# ----------------------------------------------------------------------------
def _stage3_shortcut_kernel(b_ref, w3_ref, x_ref, s1_ref, b1_ref, wsc_ref, o_ref):
    y = jnp.dot(b_ref[...], w3_ref[...], preferred_element_type=jnp.float32)
    h = jnp.maximum(x_ref[...].astype(jnp.float32) * s1_ref[...] + b1_ref[...], 0.0)
    y = y + jnp.dot(h.astype(jnp.bfloat16), wsc_ref[...],
                    preferred_element_type=jnp.float32)
    o_ref[...] = y.astype(o_ref.dtype)


def _stage3_identity_kernel(b_ref, w3_ref, res_ref, o_ref):
    y = jnp.dot(b_ref[...], w3_ref[...], preferred_element_type=jnp.float32)
    y = y + res_ref[...].astype(jnp.float32)
    o_ref[...] = y.astype(o_ref.dtype)


def stage3_shortcut(b_flat, w3_bf, x_strided, s1, b1, wsc_bf):
    M, Cmid = b_flat.shape
    Cin = x_strided.shape[1]
    Cout = w3_bf.shape[1]
    tile = _tile_rows(M)
    grid = (-(-M // tile),)
    return pl.pallas_call(
        _stage3_shortcut_kernel,
        out_shape=jax.ShapeDtypeStruct((M, Cout), jnp.float32),
        grid=grid,
        in_specs=[
            pl.BlockSpec((tile, Cmid), lambda i: (i, 0)),   # b rows
            pl.BlockSpec((Cmid, Cout), lambda i: (0, 0)),   # w3
            pl.BlockSpec((tile, Cin), lambda i: (i, 0)),    # strided x rows
            pl.BlockSpec((1, Cin), lambda i: (0, 0)),       # bn1 scale
            pl.BlockSpec((1, Cin), lambda i: (0, 0)),       # bn1 bias
            pl.BlockSpec((Cin, Cout), lambda i: (0, 0)),    # wsc
        ],
        out_specs=pl.BlockSpec((tile, Cout), lambda i: (i, 0)),
        compiler_params=pltpu.CompilerParams(
            dimension_semantics=("parallel",),
            vmem_limit_bytes=VMEM_LIMIT),
    )(b_flat, w3_bf, x_strided, s1, b1, wsc_bf)


def stage3_identity(b_flat, w3_bf, res):
    M, Cmid = b_flat.shape
    Cout = w3_bf.shape[1]
    tile = _tile_rows(M)
    grid = (-(-M // tile),)
    return pl.pallas_call(
        _stage3_identity_kernel,
        out_shape=jax.ShapeDtypeStruct((M, Cout), jnp.float32),
        grid=grid,
        in_specs=[
            pl.BlockSpec((tile, Cmid), lambda i: (i, 0)),
            pl.BlockSpec((Cmid, Cout), lambda i: (0, 0)),
            pl.BlockSpec((tile, res.shape[1]), lambda i: (i, 0)),
        ],
        out_specs=pl.BlockSpec((tile, Cout), lambda i: (i, 0)),
        compiler_params=pltpu.CompilerParams(
            dimension_semantics=("parallel",),
            vmem_limit_bytes=VMEM_LIMIT),
    )(b_flat, w3_bf, res)


# ----------------------------------------------------------------------------
# Parameters (deterministic, synthetic), BN folding, one-time prep.
# ----------------------------------------------------------------------------
def make_params(key, in_channels, out_channels, kernel_size, expand_ratio):
    mid = out_channels // expand_ratio
    ks = jax.random.split(key, 8)

    def bn(k, c):
        k1, k2, k3, k4 = jax.random.split(k, 4)
        return dict(
            gamma=jax.random.uniform(k1, (c,), jnp.float32, 0.8, 1.2),
            beta=0.1 * jax.random.normal(k2, (c,), jnp.float32),
            mean=0.1 * jax.random.normal(k3, (c,), jnp.float32),
            var=jax.random.uniform(k4, (c,), jnp.float32, 0.5, 1.5),
        )

    p = {}
    p["bn1"] = bn(ks[0], in_channels)
    # NOTE: PyTorch declares bn2/bn3 with out_channels features; the forward
    # only type-checks when mid == out_channels (expand_ratio == 1), which is
    # the configuration exercised below.
    p["bn2"] = bn(ks[1], mid)
    p["bn3"] = bn(ks[2], mid)
    p["w1"] = 0.1 * jax.random.normal(ks[3], (mid, in_channels, 1, 1), jnp.float32)
    p["w2"] = 0.1 * jax.random.normal(
        ks[4], (mid, mid, kernel_size, kernel_size), jnp.float32)
    p["w3"] = 0.1 * jax.random.normal(ks[5], (out_channels, mid, 1, 1), jnp.float32)
    p["wsc"] = 0.1 * jax.random.normal(
        ks[6], (out_channels, in_channels, 1, 1), jnp.float32)
    return p


def _fold_bn(bn):
    s = bn["gamma"] / jnp.sqrt(bn["var"] + EPS)
    return s, bn["beta"] - bn["mean"] * s


def prepare_params(p, *, kernel_size):
    """One-time BN folding + weight relayout + bf16 cast (hoisted out of the
    per-call forward so repeated inference pays no weight HBM passes)."""
    K = kernel_size
    Cmid = p["w1"].shape[0]
    s1, b1 = _fold_bn(p["bn1"])
    s2, b2 = _fold_bn(p["bn2"])
    s3, b3 = _fold_bn(p["bn3"])
    return dict(
        s1=s1.reshape(1, -1), b1=b1.reshape(1, -1),
        s2=s2.reshape(1, -1), b2=b2.reshape(1, -1),
        s3=s3.reshape(1, -1), b3=b3.reshape(1, -1),
        w1=jnp.transpose(p["w1"][:, :, 0, 0], (1, 0)).astype(jnp.bfloat16),
        # (K, K, Cin_mid, Cout_mid) -> rows = (kh, kw, cin) stacked along the
        # contraction dim, matching the in-kernel tap concatenation order.
        w2=jnp.transpose(p["w2"], (2, 3, 1, 0)).reshape(K * K * Cmid, Cmid)
            .astype(jnp.bfloat16),
        w3=jnp.transpose(p["w3"][:, :, 0, 0], (1, 0)).astype(jnp.bfloat16),
        wsc=jnp.transpose(p["wsc"][:, :, 0, 0], (1, 0)).astype(jnp.bfloat16),
    )


# ----------------------------------------------------------------------------
# Bottleneck forward built on the Pallas kernels
# ----------------------------------------------------------------------------
def bottleneck_forward(x_nchw, prep, *, stride, kernel_size):
    N, Cin, H, W = x_nchw.shape
    K = kernel_size
    pad = (K - 1) // 2
    s = stride
    Cmid = prep["w1"].shape[1]
    Cout = prep["w3"].shape[1]
    Ho = (H + 2 * pad - K) // s + 1
    Wo = (W + 2 * pad - K) // s + 1

    x = jnp.transpose(x_nchw, (0, 2, 3, 1))          # -> NHWC
    x_flat = x.reshape(N * H * W, Cin)
    use_shortcut = (s > 1) or (Cin != Cout)

    # Stage 1: a = relu(bn2(relu(bn1(x)) @ w1)); reads x exactly once.
    a_flat = stage1(x_flat, prep["s1"], prep["b1"], prep["w1"],
                    prep["s2"], prep["b2"])

    # Stage 2: phase (space-to-depth) layout of the halo-padded activation.
    TH = _pick_th(Ho, Wo)
    n_rb = -(-Ho // TH)
    dh_max = (K - 1) // s
    Hq = -(-(H + 2 * pad) // s)
    Wq = -(-(W + 2 * pad) // s)
    Hq_a = max(Hq, n_rb * TH + dh_max)   # keep ragged row-block slices in-bounds
    a = a_flat.reshape(N, H, W, Cmid)
    ap = jnp.pad(a, ((0, 0),
                     (pad, Hq_a * s - H - pad),
                     (pad, Wq * s - W - pad),
                     (0, 0)))                         # single pad pass
    if s == 1:
        phases = ap.reshape(N, 1, Hq_a, Wq, Cmid)     # relayout skipped
    else:
        phases = (ap.reshape(N, Hq_a, s, Wq, s, Cmid)
                    .transpose(0, 2, 4, 1, 3, 5)
                    .reshape(N, s * s, Hq_a, Wq, Cmid))
    b_flat = conv2(phases, prep["w2"], prep["s3"], prep["b3"],
                   K=K, stride=s, Ho=Ho, Wo=Wo, TH=TH)

    # Stage 3: conv3 + residual (shortcut bn1+relu+1x1 conv fused in-kernel).
    if use_shortcut:
        xs = x[:, ::s, ::s, :].reshape(N * Ho * Wo, Cin)
        out_flat = stage3_shortcut(b_flat, prep["w3"], xs,
                                   prep["s1"], prep["b1"], prep["wsc"])
    else:
        out_flat = stage3_identity(b_flat, prep["w3"], x_flat)

    out = out_flat.reshape(N, Ho, Wo, Cout)
    return jnp.transpose(out, (0, 3, 1, 2))           # -> NCHW


# ----------------------------------------------------------------------------
# Pure-JAX reference (eval-mode BN), used only for validation.
# ----------------------------------------------------------------------------
def _bn_eval_nchw(x, bn):
    s = bn["gamma"] / jnp.sqrt(bn["var"] + EPS)
    b = bn["beta"] - bn["mean"] * s
    return x * s[None, :, None, None] + b[None, :, None, None]


def bottleneck_reference(x, p, *, stride, kernel_size):
    dn = ("NCHW", "OIHW", "NCHW")
    pad = (kernel_size - 1) // 2
    Cin, Cout = x.shape[1], p["w3"].shape[0]
    h = jax.nn.relu(_bn_eval_nchw(x, p["bn1"]))
    if stride > 1 or Cin != Cout:
        sc = lax.conv_general_dilated(h, p["wsc"], (stride, stride), "VALID",
                                      dimension_numbers=dn)
    else:
        sc = x
    a = lax.conv_general_dilated(h, p["w1"], (1, 1), "VALID",
                                 dimension_numbers=dn)
    a = jax.nn.relu(_bn_eval_nchw(a, p["bn2"]))
    b = lax.conv_general_dilated(a, p["w2"], (stride, stride),
                                 ((pad, pad), (pad, pad)),
                                 dimension_numbers=dn)
    b = jax.nn.relu(_bn_eval_nchw(b, p["bn3"]))
    c = lax.conv_general_dilated(b, p["w3"], (1, 1), "VALID",
                                 dimension_numbers=dn)
    return c + sc


if __name__ == "__main__":
    key = jax.random.PRNGKey(0)
    configs = [
        # (in_channels, out_channels, kernel_size, stride, expand_ratio)
        dict(in_channels=4, out_channels=8, kernel_size=3, stride=2, expand_ratio=1),
        dict(in_channels=4, out_channels=4, kernel_size=3, stride=1, expand_ratio=1),
    ]
    for cfg in configs:
        kx, kp, key = jax.random.split(key, 3)
        x = jax.random.normal(kx, (2, cfg["in_channels"], 16, 16), jnp.float32)
        params = make_params(kp, cfg["in_channels"], cfg["out_channels"],
                             cfg["kernel_size"], cfg["expand_ratio"])
        prep = prepare_params(params, kernel_size=cfg["kernel_size"])

        fwd = jax.jit(functools.partial(bottleneck_forward,
                                        stride=cfg["stride"],
                                        kernel_size=cfg["kernel_size"]))
        out = jax.block_until_ready(fwd(x, prep))

        ref = bottleneck_reference(x, params, stride=cfg["stride"],
                                   kernel_size=cfg["kernel_size"])
        assert out.shape == ref.shape, (out.shape, ref.shape)
        max_err = float(jnp.max(jnp.abs(out - ref)))
        # bf16 intermediates/weights -> slightly looser tolerance than pure f32.
        assert jnp.allclose(out, ref, rtol=2e-2, atol=2e-2), (cfg, max_err)
    print("KERNEL_OK")
</pallas_src>

<mosaic_0001>
module attributes {stable_mosaic.version = 11 : i64} {
  func.func @_stage1_kernel(%arg0: i32, %arg1: memref<256x4xf32, #tpu.memory_space<vmem>>, %arg2: memref<1x4xf32, #tpu.memory_space<vmem>>, %arg3: memref<1x4xf32, #tpu.memory_space<vmem>>, %arg4: memref<4x8xbf16, #tpu.memory_space<vmem>>, %arg5: memref<1x8xf32, #tpu.memory_space<vmem>>, %arg6: memref<1x8xf32, #tpu.memory_space<vmem>>, %arg7: memref<256x8xbf16, #tpu.memory_space<vmem>>) attributes {dimension_semantics = [#tpu.dimension_semantics<parallel>], iteration_bounds = array<i64: 2>, scalar_prefetch = 0 : i64, scratch_operands = 0 : i64, tpu.core_type = #tpu.core_type<tc>, window_params = [{transform_indices = @transform_0, window_bounds = array<i64: 256, 4>}, {pipeline_mode = #tpu.pipeline_mode<synchronous>, transform_indices = @transform_1, window_bounds = array<i64: 1, 4>}, {pipeline_mode = #tpu.pipeline_mode<synchronous>, transform_indices = @transform_2, window_bounds = array<i64: 1, 4>}, {pipeline_mode = #tpu.pipeline_mode<synchronous>, transform_indices = @transform_3, window_bounds = array<i64: 4, 8>}, {pipeline_mode = #tpu.pipeline_mode<synchronous>, transform_indices = @transform_4, window_bounds = array<i64: 1, 8>}, {pipeline_mode = #tpu.pipeline_mode<synchronous>, transform_indices = @transform_5, window_bounds = array<i64: 1, 8>}, {transform_indices = @transform_6, window_bounds = array<i64: 256, 8>}]} {
    %c0 = arith.constant 0 : index
    %c0_0 = arith.constant 0 : index
    %0 = vector.load %arg1[%c0, %c0_0] : memref<256x4xf32, #tpu.memory_space<vmem>>, vector<256x4xf32>
    %c0_1 = arith.constant 0 : index
    %c0_2 = arith.constant 0 : index
    %1 = vector.load %arg2[%c0_1, %c0_2] : memref<1x4xf32, #tpu.memory_space<vmem>>, vector<1x4xf32>
    %2 = vector.broadcast %1 : vector<1x4xf32> to vector<256x4xf32>
    %3 = arith.mulf %0, %2 : vector<256x4xf32>
    %c0_3 = arith.constant 0 : index
    %c0_4 = arith.constant 0 : index
    %4 = vector.load %arg3[%c0_3, %c0_4] : memref<1x4xf32, #tpu.memory_space<vmem>>, vector<1x4xf32>
    %5 = vector.broadcast %4 : vector<1x4xf32> to vector<256x4xf32>
    %6 = arith.addf %3, %5 : vector<256x4xf32>
    %cst = arith.constant 0.000000e+00 : f32
    %7 = vector.broadcast %cst : f32 to vector<256x4xf32>
    %8 = arith.maximumf %6, %7 : vector<256x4xf32>
    %9 = arith.truncf %8 : vector<256x4xf32> to vector<256x4xbf16>
    %c0_5 = arith.constant 0 : index
    %c0_6 = arith.constant 0 : index
    %10 = vector.load %arg4[%c0_5, %c0_6] : memref<4x8xbf16, #tpu.memory_space<vmem>>, vector<4x8xbf16>
    %cst_7 = arith.constant dense<0.000000e+00> : vector<256x8xf32>
    %11 = tpu.matmul %9, %10, %cst_7 {dimension_numbers = #tpu.dot_dimension_numbers<[1], [0], [0], [1], [0, 0, 1, 1], [], []>} : vector<256x4xbf16>, vector<4x8xbf16>, vector<256x8xf32> -> vector<256x8xf32>
    %c0_8 = arith.constant 0 : index
    %c0_9 = arith.constant 0 : index
    %12 = vector.load %arg5[%c0_8, %c0_9] : memref<1x8xf32, #tpu.memory_space<vmem>>, vector<1x8xf32>
    %13 = vector.broadcast %12 : vector<1x8xf32> to vector<256x8xf32>
    %14 = arith.mulf %11, %13 : vector<256x8xf32>
    %c0_10 = arith.constant 0 : index
    %c0_11 = arith.constant 0 : index
    %15 = vector.load %arg6[%c0_10, %c0_11] : memref<1x8xf32, #tpu.memory_space<vmem>>, vector<1x8xf32>
    %16 = vector.broadcast %15 : vector<1x8xf32> to vector<256x8xf32>
    %17 = arith.addf %14, %16 : vector<256x8xf32>
    %cst_12 = arith.constant 0.000000e+00 : f32
    %18 = vector.broadcast %cst_12 : f32 to vector<256x8xf32>
    %19 = arith.maximumf %17, %18 : vector<256x8xf32>
    %20 = arith.truncf %19 : vector<256x8xf32> to vector<256x8xbf16>
    %c0_13 = arith.constant 0 : index
    %c0_14 = arith.constant 0 : index
    %21 = vector.load %arg7[%c0_13, %c0_14] : memref<256x8xbf16, #tpu.memory_space<vmem>>, vector<256x8xbf16>
    tpu.vector_store %arg7[%c0_13, %c0_14], %20 {strides = array<i32>} : memref<256x8xbf16, #tpu.memory_space<vmem>>, vector<256x8xbf16>,
    return
  }
  func.func @transform_0(%arg0: i32) -> (i32, i32) {
    %c0_i32 = arith.constant 0 : i32
    %c0_i32_0 = arith.constant 0 : i32
    return %arg0, %c0_i32 : i32, i32
  }
  func.func @transform_1(%arg0: i32) -> (i32, i32) {
    %c0_i32 = arith.constant 0 : i32
    %c0_i32_0 = arith.constant 0 : i32
    %c0_i32_1 = arith.constant 0 : i32
    return %c0_i32, %c0_i32_0 : i32, i32
  }
  func.func @transform_2(%arg0: i32) -> (i32, i32) {
    %c0_i32 = arith.constant 0 : i32
    %c0_i32_0 = arith.constant 0 : i32
    %c0_i32_1 = arith.constant 0 : i32
    return %c0_i32, %c0_i32_0 : i32, i32
  }
  func.func @transform_3(%arg0: i32) -> (i32, i32) {
    %c0_i32 = arith.constant 0 : i32
    %c0_i32_0 = arith.constant 0 : i32
    %c0_i32_1 = arith.constant 0 : i32
    return %c0_i32, %c0_i32_0 : i32, i32
  }
  func.func @transform_4(%arg0: i32) -> (i32, i32) {
    %c0_i32 = arith.constant 0 : i32
    %c0_i32_0 = arith.constant 0 : i32
    %c0_i32_1 = arith.constant 0 : i32
    return %c0_i32, %c0_i32_0 : i32, i32
  }
  func.func @transform_5(%arg0: i32) -> (i32, i32) {
    %c0_i32 = arith.constant 0 : i32
    %c0_i32_0 = arith.constant 0 : i32
    %c0_i32_1 = arith.constant 0 : i32
    return %c0_i32, %c0_i32_0 : i32, i32
  }
  func.func @transform_6(%arg0: i32) -> (i32, i32) {
    %c0_i32 = arith.constant 0 : i32
    %c0_i32_0 = arith.constant 0 : i32
    return %arg0, %c0_i32 : i32, i32
  }
}

module attributes {stable_mosaic.version = 11 : i64} {
  func.func @_conv2_kernel(%arg0: i32, %arg1: i32, %arg2: memref<1x4x9x9x8xbf16, #tpu.memory_space<vmem>>, %arg3: memref<72x8xbf16, #tpu.memory_space<vmem>>, %arg4: memref<1x8xf32, #tpu.memory_space<vmem>>, %arg5: memref<1x8xf32, #tpu.memory_space<vmem>>, %arg6: memref<1x4x8x8xbf16, #tpu.memory_space<vmem>>) attributes {dimension_semantics = [#tpu.dimension_semantics<parallel>, #tpu.dimension_semantics<parallel>], iteration_bounds = array<i64: 2, 2>, scalar_prefetch = 0 : i64, scratch_operands = 0 : i64, tpu.core_type = #tpu.core_type<tc>, window_params = [{transform_indices = @transform_0, window_bounds = array<i64: 1, 4, 9, 9, 8>}, {pipeline_mode = #tpu.pipeline_mode<synchronous>, transform_indices = @transform_1, window_bounds = array<i64: 72, 8>}, {pipeline_mode = #tpu.pipeline_mode<synchronous>, transform_indices = @transform_2, window_bounds = array<i64: 1, 8>}, {pipeline_mode = #tpu.pipeline_mode<synchronous>, transform_indices = @transform_3, window_bounds = array<i64: 1, 8>}, {transform_indices = @transform_4, window_bounds = array<i64: 1, 4, 8, 8>}]} {
    %c4_i32 = arith.constant 4 : i32
    %0 = arith.muli %arg1, %c4_i32 : i32
    %c0_i32 = arith.constant 0 : i32
    %1 = arith.addi %0, %c0_i32 : i32
    %c0 = arith.constant 0 : index
    %c0_0 = arith.constant 0 : index
    %2 = arith.index_cast %1 : i32 to index
    %c0_1 = arith.constant 0 : index
    %c0_2 = arith.constant 0 : index
    %3 = vector.load %arg2[%c0, %c0_0, %2, %c0_1, %c0_2] : memref<1x4x9x9x8xbf16, #tpu.memory_space<vmem>>, vector<1x1x4x8x8xbf16>
    %4 = vector.shape_cast %3 : vector<1x1x4x8x8xbf16> to vector<4x8x8xbf16>
    %c0_i32_3 = arith.constant 0 : i32
    %5 = arith.addi %0, %c0_i32_3 : i32
    %c0_4 = arith.constant 0 : index
    %c1 = arith.constant 1 : index
    %6 = arith.index_cast %5 : i32 to index
    %c0_5 = arith.constant 0 : index
    %c0_6 = arith.constant 0 : index
    %7 = vector.load %arg2[%c0_4, %c1, %6, %c0_5, %c0_6] : memref<1x4x9x9x8xbf16, #tpu.memory_space<vmem>>, vector<1x1x4x8x8xbf16>
    %8 = vector.shape_cast %7 : vector<1x1x4x8x8xbf16> to vector<4x8x8xbf16>
    %c0_i32_7 = arith.constant 0 : i32
    %9 = arith.addi %0, %c0_i32_7 : i32
    %c0_8 = arith.constant 0 : index
    %c0_9 = arith.constant 0 : index
    %10 = arith.index_cast %9 : i32 to index
    %c1_10 = arith.constant 1 : index
    %c0_11 = arith.constant 0 : index
    %11 = vector.load %arg2[%c0_8, %c0_9, %10, %c1_10, %c0_11] : memref<1x4x9x9x8xbf16, #tpu.memory_space<vmem>>, vector<1x1x4x8x8xbf16>
    %12 = vector.shape_cast %11 : vector<1x1x4x8x8xbf16> to vector<4x8x8xbf16>
    %c0_i32_12 = arith.constant 0 : i32
    %13 = arith.addi %0, %c0_i32_12 : i32
    %c0_13 = arith.constant 0 : index
    %c2 = arith.constant 2 : index
    %14 = arith.index_cast %13 : i32 to index
    %c0_14 = arith.constant 0 : index
    %c0_15 = arith.constant 0 : index
    %15 = vector.load %arg2[%c0_13, %c2, %14, %c0_14, %c0_15] : memref<1x4x9x9x8xbf16, #tpu.memory_space<vmem>>, vector<1x1x4x8x8xbf16>
    %16 = vector.shape_cast %15 : vector<1x1x4x8x8xbf16> to vector<4x8x8xbf16>
    %c0_i32_16 = arith.constant 0 : i32
    %17 = arith.addi %0, %c0_i32_16 : i32
    %c0_17 = arith.constant 0 : index
    %c3 = arith.constant 3 : index
    %18 = arith.index_cast %17 : i32 to index
    %c0_18 = arith.constant 0 : index
    %c0_19 = arith.constant 0 : index
    %19 = vector.load %arg2[%c0_17, %c3, %18, %c0_18, %c0_19] : memref<1x4x9x9x8xbf16, #tpu.memory_space<vmem>>, vector<1x1x4x8x8xbf16>
    %20 = vector.shape_cast %19 : vector<1x1x4x8x8xbf16> to vector<4x8x8xbf16>
    %c0_i32_20 = arith.constant 0 : i32
    %21 = arith.addi %0, %c0_i32_20 : i32
    %c0_21 = arith.constant 0 : index
    %c2_22 = arith.constant 2 : index
    %22 = arith.index_cast %21 : i32 to index
    %c1_23 = arith.constant 1 : index
    %c0_24 = arith.constant 0 : index
    %23 = vector.load %arg2[%c0_21, %c2_22, %22, %c1_23, %c0_24] : memref<1x4x9x9x8xbf16, #tpu.memory_space<vmem>>, vector<1x1x4x8x8xbf16>
    %24 = vector.shape_cast %23 : vector<1x1x4x8x8xbf16> to vector<4x8x8xbf16>
    %c1_i32 = arith.constant 1 : i32
    %25 = arith.addi %0, %c1_i32 : i32
    %c0_25 = arith.constant 0 : index
    %c0_26 = arith.constant 0 : index
    %26 = arith.index_cast %25 : i32 to index
    %c0_27 = arith.constant 0 : index
    %c0_28 = arith.constant 0 : index
    %27 = vector.load %arg2[%c0_25, %c0_26, %26, %c0_27, %c0_28] : memref<1x4x9x9x8xbf16, #tpu.memory_space<vmem>>, vector<1x1x4x8x8xbf16>
    %28 = vector.shape_cast %27 : vector<1x1x4x8x8xbf16> to vector<4x8x8xbf16>
    %c1_i32_29 = arith.constant 1 : i32
    %29 = arith.addi %0, %c1_i32_29 : i32
    %c0_30 = arith.constant 0 : index
    %c1_31 = arith.constant 1 : index
    %30 = arith.index_cast %29 : i32 to index
    %c0_32 = arith.constant 0 : index
    %c0_33 = arith.constant 0 : index
    %31 = vector.load %arg2[%c0_30, %c1_31, %30, %c0_32, %c0_33] : memref<1x4x9x9x8xbf16, #tpu.memory_space<vmem>>, vector<1x1x4x8x8xbf16>
    %32 = vector.shape_cast %31 : vector<1x1x4x8x8xbf16> to vector<4x8x8xbf16>
    %c1_i32_34 = arith.constant 1 : i32
    %33 = arith.addi %0, %c1_i32_34 : i32
    %c0_35 = arith.constant 0 : index
    %c0_36 = arith.constant 0 : index
    %34 = arith.index_cast %33 : i32 to index
    %c1_37 = arith.constant 1 : index
    %c0_38 = arith.constant 0 : index
    %35 = vector.load %arg2[%c0_35, %c0_36, %34, %c1_37, %c0_38] : memref<1x4x9x9x8xbf16, #tpu.memory_space<vmem>>, vector<1x1x4x8x8xbf16>
    %36 = vector.shape_cast %35 : vector<1x1x4x8x8xbf16> to vector<4x8x8xbf16>
    %37 = tpu.concatenate %4, %8, %12, %16, %20, %24, %28, %32, %36 in 2 : vector<4x8x8xbf16>, vector<4x8x8xbf16>, vector<4x8x8xbf16>, vector<4x8x8xbf16>, vector<4x8x8xbf16>, vector<4x8x8xbf16>, vector<4x8x8xbf16>, vector<4x8x8xbf16>, vector<4x8x8xbf16> -> vector<4x8x72xbf16>
    %38 = vector.shape_cast %37 : vector<4x8x72xbf16> to vector<32x72xbf16>
    %c0_39 = arith.constant 0 : index
    %c0_40 = arith.constant 0 : index
    %39 = vector.load %arg3[%c0_39, %c0_40] : memref<72x8xbf16, #tpu.memory_space<vmem>>, vector<72x8xbf16>
    %cst = arith.constant dense<0.000000e+00> : vector<32x8xf32>
    %40 = tpu.matmul %38, %39, %cst {dimension_numbers = #tpu.dot_dimension_numbers<[1], [0], [0], [1], [0, 0, 1, 1], [], []>} : vector<32x72xbf16>, vector<72x8xbf16>, vector<32x8xf32> -> vector<32x8xf32>
    %c0_41 = arith.constant 0 : index
    %c0_42 = arith.constant 0 : index
    %41 = vector.load %arg4[%c0_41, %c0_42] : memref<1x8xf32, #tpu.memory_space<vmem>>, vector<1x8xf32>
    %42 = vector.broadcast %41 : vector<1x8xf32> to vector<32x8xf32>
    %43 = arith.mulf %40, %42 : vector<32x8xf32>
    %c0_43 = arith.constant 0 : index
    %c0_44 = arith.constant 0 : index
    %44 = vector.load %arg5[%c0_43, %c0_44] : memref<1x8xf32, #tpu.memory_space<vmem>>, vector<1x8xf32>
    %45 = vector.broadcast %44 : vector<1x8xf32> to vector<32x8xf32>
    %46 = arith.addf %43, %45 : vector<32x8xf32>
    %cst_45 = arith.constant 0.000000e+00 : f32
    %47 = vector.broadcast %cst_45 : f32 to vector<32x8xf32>
    %48 = arith.maximumf %46, %47 : vector<32x8xf32>
    %49 = vector.shape_cast %48 : vector<32x8xf32> to vector<4x8x8xf32>
    %50 = arith.truncf %49 : vector<4x8x8xf32> to vector<4x8x8xbf16>
    %c0_46 = arith.constant 0 : index
    %c0_47 = arith.constant 0 : index
    %c0_48 = arith.constant 0 : index
    %c0_49 = arith.constant 0 : index
    %51 = vector.load %arg6[%c0_46, %c0_47, %c0_48, %c0_49] : memref<1x4x8x8xbf16, #tpu.memory_space<vmem>>, vector<1x4x8x8xbf16>
    %52 = vector.shape_cast %51 : vector<1x4x8x8xbf16> to vector<4x8x8xbf16>
    %53 = vector.shape_cast %50 : vector<4x8x8xbf16> to vector<1x4x8x8xbf16>
    tpu.vector_store %arg6[%c0_46, %c0_47, %c0_48, %c0_49], %53 {strides = array<i32>} : memref<1x4x8x8xbf16, #tpu.memory_space<vmem>>, vector<1x4x8x8xbf16>,
    return
  }
  func.func @transform_0(%arg0: i32, %arg1: i32) -> (i32, i32, i32, i32, i32) {
    %c0_i32 = arith.constant 0 : i32
    %c0_i32_0 = arith.constant 0 : i32
    %c0_i32_1 = arith.constant 0 : i32
    %c0_i32_2 = arith.constant 0 : i32
    %c0_i32_3 = arith.constant 0 : i32
    return %arg0, %c0_i32, %c0_i32_0, %c0_i32_1, %c0_i32_2 : i32, i32, i32, i32, i32
  }
  func.func @transform_1(%arg0: i32, %arg1: i32) -> (i32, i32) {
    %c0_i32 = arith.constant 0 : i32
    %c0_i32_0 = arith.constant 0 : i32
    %c0_i32_1 = arith.constant 0 : i32
    return %c0_i32, %c0_i32_0 : i32, i32
  }
  func.func @transform_2(%arg0: i32, %arg1: i32) -> (i32, i32) {
    %c0_i32 = arith.constant 0 : i32
    %c0_i32_0 = arith.constant 0 : i32
    %c0_i32_1 = arith.constant 0 : i32
    return %c0_i32, %c0_i32_0 : i32, i32
  }
  func.func @transform_3(%arg0: i32, %arg1: i32) -> (i32, i32) {
    %c0_i32 = arith.constant 0 : i32
    %c0_i32_0 = arith.constant 0 : i32
    %c0_i32_1 = arith.constant 0 : i32
    return %c0_i32, %c0_i32_0 : i32, i32
  }
  func.func @transform_4(%arg0: i32, %arg1: i32) -> (i32, i32, i32, i32) {
    %c0_i32 = arith.constant 0 : i32
    %c0_i32_0 = arith.constant 0 : i32
    %c0_i32_1 = arith.constant 0 : i32
    return %arg0, %arg1, %c0_i32, %c0_i32_0 : i32, i32, i32, i32
  }
}

module attributes {stable_mosaic.version = 11 : i64} {
  func.func @_stage3_shortcut_kernel(%arg0: i32, %arg1: memref<64x8xbf16, #tpu.memory_space<vmem>>, %arg2: memref<8x8xbf16, #tpu.memory_space<vmem>>, %arg3: memref<64x4xf32, #tpu.memory_space<vmem>>, %arg4: memref<1x4xf32, #tpu.memory_space<vmem>>, %arg5: memref<1x4xf32, #tpu.memory_space<vmem>>, %arg6: memref<4x8xbf16, #tpu.memory_space<vmem>>, %arg7: memref<64x8xf32, #tpu.memory_space<vmem>>) attributes {dimension_semantics = [#tpu.dimension_semantics<parallel>], iteration_bounds = array<i64: 2>, scalar_prefetch = 0 : i64, scratch_operands = 0 : i64, tpu.core_type = #tpu.core_type<tc>, window_params = [{transform_indices = @transform_0, window_bounds = array<i64: 64, 8>}, {pipeline_mode = #tpu.pipeline_mode<synchronous>, transform_indices = @transform_1, window_bounds = array<i64: 8, 8>}, {transform_indices = @transform_2, window_bounds = array<i64: 64, 4>}, {pipeline_mode = #tpu.pipeline_mode<synchronous>, transform_indices = @transform_3, window_bounds = array<i64: 1, 4>}, {pipeline_mode = #tpu.pipeline_mode<synchronous>, transform_indices = @transform_4, window_bounds = array<i64: 1, 4>}, {pipeline_mode = #tpu.pipeline_mode<synchronous>, transform_indices = @transform_5, window_bounds = array<i64: 4, 8>}, {transform_indices = @transform_6, window_bounds = array<i64: 64, 8>}]} {
    %c0 = arith.constant 0 : index
    %c0_0 = arith.constant 0 : index
    %0 = vector.load %arg1[%c0, %c0_0] : memref<64x8xbf16, #tpu.memory_space<vmem>>, vector<64x8xbf16>
    %c0_1 = arith.constant 0 : index
    %c0_2 = arith.constant 0 : index
    %1 = vector.load %arg2[%c0_1, %c0_2] : memref<8x8xbf16, #tpu.memory_space<vmem>>, vector<8x8xbf16>
    %cst = arith.constant dense<0.000000e+00> : vector<64x8xf32>
    %2 = tpu.matmul %0, %1, %cst {dimension_numbers = #tpu.dot_dimension_numbers<[1], [0], [0], [1], [0, 0, 1, 1], [], []>} : vector<64x8xbf16>, vector<8x8xbf16>, vector<64x8xf32> -> vector<64x8xf32>
    %c0_3 = arith.constant 0 : index
    %c0_4 = arith.constant 0 : index
    %3 = vector.load %arg3[%c0_3, %c0_4] : memref<64x4xf32, #tpu.memory_space<vmem>>, vector<64x4xf32>
    %c0_5 = arith.constant 0 : index
    %c0_6 = arith.constant 0 : index
    %4 = vector.load %arg4[%c0_5, %c0_6] : memref<1x4xf32, #tpu.memory_space<vmem>>, vector<1x4xf32>
    %5 = vector.broadcast %4 : vector<1x4xf32> to vector<64x4xf32>
    %6 = arith.mulf %3, %5 : vector<64x4xf32>
    %c0_7 = arith.constant 0 : index
    %c0_8 = arith.constant 0 : index
    %7 = vector.load %arg5[%c0_7, %c0_8] : memref<1x4xf32, #tpu.memory_space<vmem>>, vector<1x4xf32>
    %8 = vector.broadcast %7 : vector<1x4xf32> to vector<64x4xf32>
    %9 = arith.addf %6, %8 : vector<64x4xf32>
    %cst_9 = arith.constant 0.000000e+00 : f32
    %10 = vector.broadcast %cst_9 : f32 to vector<64x4xf32>
    %11 = arith.maximumf %9, %10 : vector<64x4xf32>
    %12 = arith.truncf %11 : vector<64x4xf32> to vector<64x4xbf16>
    %c0_10 = arith.constant 0 : index
    %c0_11 = arith.constant 0 : index
    %13 = vector.load %arg6[%c0_10, %c0_11] : memref<4x8xbf16, #tpu.memory_space<vmem>>, vector<4x8xbf16>
    %cst_12 = arith.constant dense<0.000000e+00> : vector<64x8xf32>
    %14 = tpu.matmul %12, %13, %cst_12 {dimension_numbers = #tpu.dot_dimension_numbers<[1], [0], [0], [1], [0, 0, 1, 1], [], []>} : vector<64x4xbf16>, vector<4x8xbf16>, vector<64x8xf32> -> vector<64x8xf32>
    %15 = arith.addf %2, %14 : vector<64x8xf32>
    %c0_13 = arith.constant 0 : index
    %c0_14 = arith.constant 0 : index
    %16 = vector.load %arg7[%c0_13, %c0_14] : memref<64x8xf32, #tpu.memory_space<vmem>>, vector<64x8xf32>
    tpu.vector_store %arg7[%c0_13, %c0_14], %15 {strides = array<i32>} : memref<64x8xf32, #tpu.memory_space<vmem>>, vector<64x8xf32>,
    return
  }
  func.func @transform_0(%arg0: i32) -> (i32, i32) {
    %c0_i32 = arith.constant 0 : i32
    %c0_i32_0 = arith.constant 0 : i32
    return %arg0, %c0_i32 : i32, i32
  }
  func.func @transform_1(%arg0: i32) -> (i32, i32) {
    %c0_i32 = arith.constant 0 : i32
    %c0_i32_0 = arith.constant 0 : i32
    %c0_i32_1 = arith.constant 0 : i32
    return %c0_i32, %c0_i32_0 : i32, i32
  }
  func.func @transform_2(%arg0: i32) -> (i32, i32) {
    %c0_i32 = arith.constant 0 : i32
    %c0_i32_0 = arith.constant 0 : i32
    return %arg0, %c0_i32 : i32, i32
  }
  func.func @transform_3(%arg0: i32) -> (i32, i32) {
    %c0_i32 = arith.constant 0 : i32
    %c0_i32_0 = arith.constant 0 : i32
    %c0_i32_1 = arith.constant 0 : i32
    return %c0_i32, %c0_i32_0 : i32, i32
  }
  func.func @transform_4(%arg0: i32) -> (i32, i32) {
    %c0_i32 = arith.constant 0 : i32
    %c0_i32_0 = arith.constant 0 : i32
    %c0_i32_1 = arith.constant 0 : i32
    return %c0_i32, %c0_i32_0 : i32, i32
  }
  func.func @transform_5(%arg0: i32) -> (i32, i32) {
    %c0_i32 = arith.constant 0 : i32
    %c0_i32_0 = arith.constant 0 : i32
    %c0_i32_1 = arith.constant 0 : i32
    return %c0_i32, %c0_i32_0 : i32, i32
  }
  func.func @transform_6(%arg0: i32) -> (i32, i32) {
    %c0_i32 = arith.constant 0 : i32
    %c0_i32_0 = arith.constant 0 : i32
    return %arg0, %c0_i32 : i32, i32
  }
}

</mosaic_0001>

<bundles_post_ra>
// kernel: bottleneck_forward.3
= control target key start
LH: loop header
LB: loop body
LE: loop exit
PB: predicated region body
PF: predicated region fallthrough
CT: control target
= control target key end

     0   :  { %s1157_s21 = smov 0   ;;  %s1445_s0 = inlined_call_operand.vmem [shape: f32[512,4], index: 0, kind: input, shape index: {}]   ;;  %s1446_s1 = inlined_call_operand.vmem [shape: f32[1,4], index: 1, kind: input, shape index: {}]   ;;  %s1447_s2 = inlined_call_operand.vmem [shape: f32[1,4], index: 2, kind: input, shape index: {}]   ;;  %s1448_s3 = inlined_call_operand.vmem [shape: bf16[4,8], index: 3, kind: input, shape index: {}]   ;;  %s1449_s4 = inlined_call_operand.vmem [shape: f32[1,8], index: 4, kind: input, shape index: {}]   ;;  %s1450_s5 = inlined_call_operand.vmem [shape: f32[1,8], index: 5, kind: input, shape index: {}]   ;;  %s1451_s6 = inlined_call_operand.vmem [shape: bf16[512,8], index: 6, kind: output, shape index: {}]  }
   0x1 LB: > { %s956_s22 = sadd.s32 4294967295, %s1120_s21   ;;  %p960_p0 = scmp.ge.s32.totalorder %s1120_s21, 1  ;;  %s1120_s21 = sphi %s1157_s21, %s16_s21  }
   0x2   : > { %p213_p1 = scmp.lt.s32.totalorder %s1120_s21, 3 }
   0x4   : > { %p214_p2 = pnand %p960_p0, %p213_p1 }
   0x5   : > { %s961_s25 = sshll.u32 (!%p214_p2), %s956_s22, 5 }
   0x6   : > { %217 = sbr.rel (%p214_p2) target bundleno = 258 (0x102), region = 44  ;;  %p244_p3 = scmp.lt.s32.totalorder (!%p214_p2), %s961_s25, 63 }
   0xb   : > { %v414_v0 = vld [vmem:[%s1448_s3] sm:$0x3]  ;;  %vm464_vm0 = vcmask 1041408   ;;  %s1453_s25 = smov (!%p244_p3, %s961_s25), 63  ;;  %vm415_vm1 = vcmask 31744   ;;  %vm867_vm2 = vcmask 60416  }
   0xc   : > { %1104 = vmatprep.subr.msk.bf16.mxu0 %vm464_vm0, %v414_v0  ;;  %1105 = vmatprep.subr.msk.bf16.mxu1 %vm464_vm0, %v414_v0  ;;  %v466_v1 = vsel %vm464_vm0, %v414_v0, 0  ;;  %s962_s26 = sshll.u32 %s1453_s25, 3  ;;  %v1174_v2 = vld [vmem:[%s1446_s1] ss:$0 sm:$0xff]  ;;  %s964_s14 = sshll.u32 %s1453_s25, 2 }
   0xd   : > { %1069 = vmatpush3.bf16.msra.mxu0 %v466_v1  ;;  %1103 = vmatpush3.bf16.msra.mxu1 %v466_v1  ;;  %s1179_s7 = scalar_lea.vmem %s1445_s0, %s962_s26  ;;  %v1184_v3 = vld [vmem:[%s1447_s2] ss:$0 sm:$0xff]  ;;  %s1319_s17 = scalar_lea.vmem %s1451_s6, %s964_s14 }
   0xe   : > { %v256_v4 = vld [vmem:[%s1179_s7] sm:$0xff]  ;;  %v257_v5 = vld [vmem:[%s1179_s7 + $0x8] sm:$0xff]  ;;  %v258_v11 = vld [vmem:[%s1179_s7 + $0x10] sm:$0xff] }
   0xf   : > { %v272_v6 = vld [vmem:[%s1179_s7 + $0x80] sm:$0xff]  ;;  %v295_v7 = vmul.f32 %v1174_v2, %v256_v4  ;;  %v296_v8 = vmul.f32 %v1174_v2, %v257_v5  ;;  %v273_v9 = vld [vmem:[%s1179_s7 + $0x88] sm:$0xff]  ;;  %v259_v12 = vld [vmem:[%s1179_s7 + $0x18] sm:$0xff]  ;;  %v297_v14 = vmul.f32 %v1174_v2, %v258_v11 }
  0x10   : > { %v311_v10 = vmul.f32 %v1174_v2, %v272_v6  ;;  %v312_v13 = vmul.f32 %v1174_v2, %v273_v9  ;;  %v298_v15 = vmul.f32 %v1174_v2, %v259_v12  ;;  %v274_v16 = vld [vmem:[%s1179_s7 + $0x90] sm:$0xff]  ;;  %v275_v17 = vld [vmem:[%s1179_s7 + $0x98] sm:$0xff]  ;;  %v260_v26 = vld [vmem:[%s1179_s7 + $0x20] sm:$0xff] }
  0x11   : > { %v334_v18 = vadd.f32 %v1184_v3, %v295_v7  ;;  %v335_v19 = vadd.f32 %v1184_v3, %v296_v8  ;;  %v313_v21 = vmul.f32 %v1174_v2, %v274_v16  ;;  %v336_v23 = vadd.f32 %v1184_v3, %v297_v14  ;;  %v261_v27 = vld [vmem:[%s1179_s7 + $0x28] sm:$0xff]  ;;  %v276_v32 = vld [vmem:[%s1179_s7 + $0xa0] sm:$0xff]  ;;  %v262_v38 = vld [vmem:[%s1179_s7 + $0x30] sm:$0xff] }
  0x12   : > { %v350_v20 = vadd.f32 %v1184_v3, %v311_v10  ;;  %v351_v22 = vadd.f32 %v1184_v3, %v312_v13  ;;  %v337_v24 = vadd.f32 %v1184_v3, %v298_v15  ;;  %v314_v25 = vmul.f32 %v1174_v2, %v275_v17  ;;  %v277_v37 = vld [vmem:[%s1179_s7 + $0xa8] sm:$0xff]  ;;  %v263_v43 = vld [vmem:[%s1179_s7 + $0x38] sm:$0xff]  ;;  %v278_v52 = vld [vmem:[%s1179_s7 + $0xb0] sm:$0xff] }
  0x13   : > { %v366_v28 = vmax.f32 %v334_v18, 0.0  ;;  %v367_v29 = vmax.f32 %v335_v19, 0.0  ;;  %v352_v31 = vadd.f32 %v1184_v3, %v313_v21  ;;  %v368_v34 = vmax.f32 %v336_v23, 0.0  ;;  %v279_v53 = vld [vmem:[%s1179_s7 + $0xb8] sm:$0xff]  ;;  %v264_v57 = vld [vmem:[%s1179_s7 + $0x40] sm:$0xff]  ;;  %v265_v62 = vld [vmem:[%s1179_s7 + $0x48] sm:$0xff] }
  0x14   : > { %v382_v30 = vmax.f32 %v350_v20, 0.0  ;;  %v383_v33 = vmax.f32 %v351_v22, 0.0  ;;  %v369_v35 = vmax.f32 %v337_v24, 0.0  ;;  %v353_v36 = vadd.f32 %v1184_v3, %v314_v25  ;;  %v280_v5 = vld [vmem:[%s1179_s7 + $0xc0] sm:$0xff]  ;;  %v281_v6 = vld [vmem:[%s1179_s7 + $0xc8] sm:$0xff]  ;;  %v266_v15 = vld [vmem:[%s1179_s7 + $0x50] sm:$0xff] }
  0x15   : > { %v398_v39 = vpack.c.bf16 %v367_v29, %v366_v28  ;;  %v384_v40 = vmax.f32 %v352_v31, 0.0  ;;  %v299_v41 = vmul.f32 %v1174_v2, %v260_v26  ;;  %v300_v42 = vmul.f32 %v1174_v2, %v261_v27  ;;  %v267_v20 = vld [vmem:[%s1179_s7 + $0x58] sm:$0xff]  ;;  %v282_v21 = vld [vmem:[%s1179_s7 + $0xd0] sm:$0xff]  ;;  %v268_v31 = vld [vmem:[%s1179_s7 + $0x60] sm:$0xff] }
  0x16   : > { %v406_v44 = vpack.c.bf16 %v383_v33, %v382_v30  ;;  %v399_v45 = vpack.c.bf16 %v369_v35, %v368_v34  ;;  %v385_v46 = vmax.f32 %v353_v36, 0.0  ;;  %v315_v47 = vmul.f32 %v1174_v2, %v276_v32  ;;  %v283_v26 = vld [vmem:[%s1179_s7 + $0xd8] sm:$0xff]  ;;  %v269_v36 = vld [vmem:[%s1179_s7 + $0x68] sm:$0xff] }
  0x17   : > { %1070 = vmatprep.mubr.msk.bf16.mxu0 %vm415_vm1, %v398_v39  ;;  %v338_v48 = vadd.f32 %v1184_v3, %v299_v41  ;;  %v339_v49 = vadd.f32 %v1184_v3, %v300_v42  ;;  %v316_v50 = vmul.f32 %v1174_v2, %v277_v37  ;;  %v301_v51 = vmul.f32 %v1174_v2, %v262_v38  ;;  %v284_v41 = vld [vmem:[%s1179_s7 + $0xe0] sm:$0xff] }
  0x18   : > { %1086 = vmatprep.mubr.msk.bf16.mxu1 %vm415_vm1, %v406_v44  ;;  %1071 = vmatmul.mubr.msk.bf16.vlgmr.msra.gmra.mxu0 %vm415_vm1, %v399_v45  ;;  %v407_v54 = vpack.c.bf16 %v385_v46, %v384_v40  ;;  %v354_v55 = vadd.f32 %v1184_v3, %v315_v47  ;;  %v302_v56 = vmul.f32 %v1174_v2, %v263_v43  ;;  %v285_v46 = vld [vmem:[%s1179_s7 + $0xe8] sm:$0xff]  ;;  %v270_v47 = vld [vmem:[%s1179_s7 + $0x70] sm:$0xff] }
  0x19   : > { %v370_v58 = vmax.f32 %v338_v48, 0.0  ;;  %v371_v59 = vmax.f32 %v339_v49, 0.0  ;;  %v355_v60 = vadd.f32 %v1184_v3, %v316_v50  ;;  %v340_v61 = vadd.f32 %v1184_v3, %v301_v51 }
  0x1a   : > { %1087 = vmatmul.mubr.msk.bf16.vlgmr.msra.gmra.mxu1 %vm415_vm1, %v407_v54  ;;  %v386_v63 = vmax.f32 %v354_v55, 0.0  ;;  %v341_v0 = vadd.f32 %v1184_v3, %v302_v56  ;;  %v317_v1 = vmul.f32 %v1174_v2, %v278_v52  ;;  %v318_v4 = vmul.f32 %v1174_v2, %v279_v53  ;;  %v271_v52 = vld [vmem:[%s1179_s7 + $0x78] sm:$0xff] }
  0x1b   : > { %v400_v7 = vpack.c.bf16 %v371_v59, %v370_v58  ;;  %v387_v8 = vmax.f32 %v355_v60, 0.0  ;;  %v372_v9 = vmax.f32 %v340_v61, 0.0  ;;  %v303_v10 = vmul.f32 %v1174_v2, %v264_v57  ;;  %v286_v61 = vld [vmem:[%s1179_s7 + $0xf0] sm:$0xff] }
  0x1c   : > { %v373_v11 = vmax.f32 %v341_v0, 0.0  ;;  %v356_v12 = vadd.f32 %v1184_v3, %v317_v1  ;;  %v357_v13 = vadd.f32 %v1184_v3, %v318_v4  ;;  %v304_v14 = vmul.f32 %v1174_v2, %v265_v62  ;;  %v287_v62 = vld [vmem:[%s1179_s7 + $0xf8] sm:$0xff] }
  0x1d   : > { %1074 = vmatprep.mubr.msk.bf16.mxu0 %vm415_vm1, %v400_v7  ;;  %v408_v16 = vpack.c.bf16 %v387_v8, %v386_v63  ;;  %v342_v17 = vadd.f32 %v1184_v3, %v303_v10  ;;  %v319_v18 = vmul.f32 %v1174_v2, %v280_v5  ;;  %v320_v19 = vmul.f32 %v1174_v2, %v281_v6 }
  0x1e   : > { %v401_v22 = vpack.c.bf16 %v373_v11, %v372_v9  ;;  %v388_v23 = vmax.f32 %v356_v12, 0.0  ;;  %v389_v24 = vmax.f32 %v357_v13, 0.0  ;;  %v343_v25 = vadd.f32 %v1184_v3, %v304_v14 }
  0x1f   : > { %1090 = vmatprep.mubr.msk.bf16.mxu1 %vm415_vm1, %v408_v16  ;;  %v374_v27 = vmax.f32 %v342_v17, 0.0  ;;  %v358_v28 = vadd.f32 %v1184_v3, %v319_v18  ;;  %v359_v29 = vadd.f32 %v1184_v3, %v320_v19  ;;  %v305_v30 = vmul.f32 %v1174_v2, %v266_v15 }
  0x20   : > { %1075 = vmatmul.mubr.msk.bf16.gmra.mxu0 %vm415_vm1, %v401_v22  ;;  %v409_v32 = vpack.c.bf16 %v389_v24, %v388_v23  ;;  %v375_v33 = vmax.f32 %v343_v25, 0.0  ;;  %v306_v34 = vmul.f32 %v1174_v2, %v267_v20  ;;  %v321_v35 = vmul.f32 %v1174_v2, %v282_v21  ;;  %v1301_v23 = vld [vmem:[%s1449_s4] ss:$0 sm:$0xff] }
  0x21   : > { %v390_v37 = vmax.f32 %v358_v28, 0.0  ;;  %v391_v38 = vmax.f32 %v359_v29, 0.0  ;;  %v344_v39 = vadd.f32 %v1184_v3, %v305_v30  ;;  %v322_v40 = vmul.f32 %v1174_v2, %v283_v26  ;;  %v1306_v24 = vld [vmem:[%s1450_s5] ss:$0 sm:$0xff] }
  0x22   : > { %1091 = vmatmul.mubr.msk.bf16.gmra.mxu1 %vm415_vm1, %v409_v32  ;;  %v402_v42 = vpack.c.bf16 %v375_v33, %v374_v27  ;;  %v345_v43 = vadd.f32 %v1184_v3, %v306_v34  ;;  %v360_v44 = vadd.f32 %v1184_v3, %v321_v35  ;;  %v307_v45 = vmul.f32 %v1174_v2, %v268_v31 }
  0x23   : > { %v410_v48 = vpack.c.bf16 %v391_v38, %v390_v37  ;;  %v376_v49 = vmax.f32 %v344_v39, 0.0  ;;  %v361_v50 = vadd.f32 %v1184_v3, %v322_v40  ;;  %v308_v51 = vmul.f32 %v1174_v2, %v269_v36 }
  0x24   : > { %1078 = vmatprep.mubr.msk.bf16.mxu0 %vm415_vm1, %v402_v42  ;;  %v377_v53 = vmax.f32 %v345_v43, 0.0  ;;  %v392_v54 = vmax.f32 %v360_v44, 0.0  ;;  %v346_v55 = vadd.f32 %v1184_v3, %v307_v45  ;;  %v323_v56 = vmul.f32 %v1174_v2, %v284_v41 }
  0x25   : > { %1094 = vmatprep.mubr.msk.bf16.mxu1 %vm415_vm1, %v410_v48  ;;  %v393_v57 = vmax.f32 %v361_v50, 0.0  ;;  %v347_v58 = vadd.f32 %v1184_v3, %v308_v51  ;;  %v324_v59 = vmul.f32 %v1174_v2, %v285_v46  ;;  %v309_v60 = vmul.f32 %v1174_v2, %v270_v47 }
  0x26   : > { %v403_v63 = vpack.c.bf16 %v377_v53, %v376_v49  ;;  %v378_v0 = vmax.f32 %v346_v55, 0.0  ;;  %v362_v1 = vadd.f32 %v1184_v3, %v323_v56  ;;  %v310_v4 = vmul.f32 %v1174_v2, %v271_v52 }
  0x27   : > { %v411_v5 = vpack.c.bf16 %v393_v57, %v392_v54  ;;  %v379_v6 = vmax.f32 %v347_v58, 0.0  ;;  %v363_v7 = vadd.f32 %v1184_v3, %v324_v59  ;;  %v348_v8 = vadd.f32 %v1184_v3, %v309_v60 }
  0x28   : > { %1079 = vmatmul.mubr.msk.bf16.gmra.mxu0 %vm415_vm1, %v403_v63  ;;  %v394_v9 = vmax.f32 %v362_v1, 0.0  ;;  %v349_v10 = vadd.f32 %v1184_v3, %v310_v4  ;;  %v325_v11 = vmul.f32 %v1174_v2, %v286_v61  ;;  %v326_v12 = vmul.f32 %v1174_v2, %v287_v62 }
  0x29   : > { %v404_v13 = vpack.c.bf16 %v379_v6, %v378_v0  ;;  %v395_v14 = vmax.f32 %v363_v7, 0.0  ;;  %v380_v15 = vmax.f32 %v348_v8, 0.0 }
  0x2a   : > { %1095 = vmatmul.mubr.msk.bf16.gmra.mxu1 %vm415_vm1, %v411_v5  ;;  %v381_v16 = vmax.f32 %v349_v10, 0.0  ;;  %v364_v17 = vadd.f32 %v1184_v3, %v325_v11  ;;  %v365_v18 = vadd.f32 %v1184_v3, %v326_v12 }
  0x2b   : > { %1082 = vmatprep.mubr.msk.bf16.mxu0 %vm415_vm1, %v404_v13  ;;  %v412_v19 = vpack.c.bf16 %v395_v14, %v394_v9 }
  0x2c   : > { %v405_v20 = vpack.c.bf16 %v381_v16, %v380_v15  ;;  %v396_v21 = vmax.f32 %v364_v17, 0.0  ;;  %v397_v22 = vmax.f32 %v365_v18, 0.0 }
  0x2d   : > { %1098 = vmatprep.mubr.msk.bf16.mxu1 %vm415_vm1, %v412_v19 }
  0x2e   : > { %v413_v2 = vpack.c.bf16 %v397_v22, %v396_v21 }
  0x30   : > { %1083 = vmatmul.mubr.msk.bf16.gmra.mxu0 %vm415_vm1, %v405_v20 }
  0x32   : > { %1099 = vmatmul.mubr.msk.bf16.gmra.mxu1 %vm415_vm1, %v413_v2 }
  0xd8   : > { %v1072_v3 = vpop.f32.mrf.mxu0 }
  0xd9   : > { %v638_v25 = vmul.f32 %v1072_v3, %v1301_v23 }
  0xda   : > { %v1088_v26 = vpop.f32.mrf.mxu1  ;;  %v502_v27 = vpop.f32.mrf.mxu0 }
  0xdb   : > { %v677_v28 = vadd.f32 %v1306_v24, %v638_v25  ;;  %v654_v29 = vmul.f32 %v1088_v26, %v1301_v23  ;;  %v636_v30 = vmul.f32 %v1301_v23, %v502_v27 }
  0xdc   : > { %v566_v31 = vpop.f32.mrf.mxu1  ;;  %v1073_v32 = vpop.f32.mrf.mxu0 }
  0xdd   : > { %v709_v33 = vmax.f32 %v677_v28, 0.0  ;;  %v693_v34 = vadd.f32 %v1306_v24, %v654_v29  ;;  %v675_v35 = vadd.f32 %v1306_v24, %v636_v30  ;;  %v652_v36 = vmul.f32 %v1301_v23, %v566_v31 }
  0xde   : > { %v639_v37 = vmul.f32 %v1073_v32, %v1301_v23  ;;  %v1089_v38 = vpop.f32.mrf.mxu1  ;;  %v505_v39 = vpop.f32.mrf.mxu0 }
  0xdf   : > { %v1021_v40 = vpack.c.bf16 %v709_v33, %v709_v33  ;;  %v725_v41 = vmax.f32 %v693_v34, 0.0  ;;  %v707_v42 = vmax.f32 %v675_v35, 0.0  ;;  %v691_v43 = vadd.f32 %v1306_v24, %v652_v36 }
  0xe0   : > { %v678_v44 = vadd.f32 %v1306_v24, %v639_v37  ;;  %v655_v45 = vmul.f32 %v1089_v38, %v1301_v23  ;;  %v637_v46 = vmul.f32 %v1301_v23, %v505_v39  ;;  %v569_v47 = vpop.f32.mrf.mxu1  ;;  %v1076_v48 = vpop.f32.mrf.mxu0 }
  0xe1   : > { %870 = vst.msk [vmem:[%s1319_s17 + $0x8] sm:$0xf] %vm867_vm2, %v1021_v40  ;;  %v1037_v49 = vpack.c.bf16 %v725_v41, %v725_v41  ;;  %v1019_v50 = vpack.c.bf16 %v707_v42, %v707_v42  ;;  %v723_v51 = vmax.f32 %v691_v43, 0.0  ;;  %v653_v52 = vmul.f32 %v1301_v23, %v569_v47 }
  0xe2   : > { %v710_v53 = vmax.f32 %v678_v44, 0.0  ;;  %v694_v54 = vadd.f32 %v1306_v24, %v655_v45  ;;  %v676_v55 = vadd.f32 %v1306_v24, %v637_v46  ;;  %v642_v56 = vmul.f32 %v1076_v48, %v1301_v23  ;;  %v1092_v57 = vpop.f32.mrf.mxu1  ;;  %v518_v58 = vpop.f32.mrf.mxu0 }
  0xe3   : > { %886 = vst.msk [vmem:[%s1319_s17 + $0x48] sm:$0xf] %vm867_vm2, %v1037_v49  ;;  %868 = vst.msk [vmem:[%s1319_s17] sm:$0xf] %vm867_vm2, %v1019_v50  ;;  %v1035_v59 = vpack.c.bf16 %v723_v51, %v723_v51  ;;  %v692_v60 = vadd.f32 %v1306_v24, %v653_v52  ;;  %v658_v61 = vmul.f32 %v1092_v57, %v1301_v23 }
  0xe4   : > { %v640_v62 = vmul.f32 %v1301_v23, %v518_v58  ;;  %v1022_v63 = vpack.c.bf16 %v710_v53, %v710_v53  ;;  %v726_v0 = vmax.f32 %v694_v54, 0.0  ;;  %v708_v1 = vmax.f32 %v676_v55, 0.0  ;;  %v582_v5 = vpop.f32.mrf.mxu1  ;;  %v1077_v6 = vpop.f32.mrf.mxu0 }
  0xe5   : > { %v681_v4 = vadd.f32 %v1306_v24, %v642_v56  ;;  %884 = vst.msk [vmem:[%s1319_s17 + $0x40] sm:$0xf] %vm867_vm2, %v1035_v59  ;;  %v724_v7 = vmax.f32 %v692_v60, 0.0  ;;  %v697_v8 = vadd.f32 %v1306_v24, %v658_v61  ;;  %v656_v10 = vmul.f32 %v1301_v23, %v582_v5 }
  0xe6   : > { %v679_v9 = vadd.f32 %v1306_v24, %v640_v62  ;;  %871 = vst.msk [vmem:[%s1319_s17 + $0xc] sm:$0xf] %vm867_vm2, %v1022_v63  ;;  %v1038_v11 = vpack.c.bf16 %v726_v0, %v726_v0  ;;  %v1020_v12 = vpack.c.bf16 %v708_v1, %v708_v1  ;;  %v643_v14 = vmul.f32 %v1077_v6, %v1301_v23  ;;  %v1093_v15 = vpop.f32.mrf.mxu1  ;;  %v521_v16 = vpop.f32.mrf.mxu0 }
  0xe7   : > { %v713_v13 = vmax.f32 %v681_v4, 0.0  ;;  %v1036_v17 = vpack.c.bf16 %v724_v7, %v724_v7  ;;  %v729_v18 = vmax.f32 %v697_v8, 0.0  ;;  %v695_v20 = vadd.f32 %v1306_v24, %v656_v10 }
  0xe8   : > { %v711_v19 = vmax.f32 %v679_v9, 0.0  ;;  %887 = vst.msk [vmem:[%s1319_s17 + $0x4c] sm:$0xf] %vm867_vm2, %v1038_v11  ;;  %869 = vst.msk [vmem:[%s1319_s17 + $0x4] sm:$0xf] %vm867_vm2, %v1020_v12  ;;  %v682_v22 = vadd.f32 %v1306_v24, %v643_v14  ;;  %v659_v2 = vmul.f32 %v1093_v15, %v1301_v23  ;;  %v641_v3 = vmul.f32 %v1301_v23, %v521_v16  ;;  %v585_v25 = vpop.f32.mrf.mxu1  ;;  %v1080_v26 = vpop.f32.mrf.mxu0 }
  0xe9   : > { %v1025_v21 = vpack.c.bf16 %v713_v13, %v713_v13  ;;  %885 = vst.msk [vmem:[%s1319_s17 + $0x44] sm:$0xf] %vm867_vm2, %v1036_v17  ;;  %v1041_v27 = vpack.c.bf16 %v729_v18, %v729_v18  ;;  %v727_v29 = vmax.f32 %v695_v20, 0.0  ;;  %v657_v30 = vmul.f32 %v1301_v23, %v585_v25 }
  0xea   : > { %v1023_v28 = vpack.c.bf16 %v711_v19, %v711_v19  ;;  %v714_v31 = vmax.f32 %v682_v22, 0.0  ;;  %v698_v32 = vadd.f32 %v1306_v24, %v659_v2  ;;  %v680_v33 = vadd.f32 %v1306_v24, %v641_v3  ;;  %v1096_v35 = vpop.f32.mrf.mxu1  ;;  %v534_v36 = vpop.f32.mrf.mxu0 }
  0xeb   : > { %874 = vst.msk [vmem:[%s1319_s17 + $0x18] sm:$0xf] %vm867_vm2, %v1025_v21  ;;  %v646_v34 = vmul.f32 %v1080_v26, %v1301_v23  ;;  %890 = vst.msk [vmem:[%s1319_s17 + $0x58] sm:$0xf] %vm867_vm2, %v1041_v27  ;;  %v1039_v37 = vpack.c.bf16 %v727_v29, %v727_v29  ;;  %v696_v38 = vadd.f32 %v1306_v24, %v657_v30 }
  0xec   : > { %872 = vst.msk [vmem:[%s1319_s17 + $0x10] sm:$0xf] %vm867_vm2, %v1023_v28  ;;  %v662_v39 = vmul.f32 %v1096_v35, %v1301_v23  ;;  %v644_v40 = vmul.f32 %v1301_v23, %v534_v36  ;;  %v1026_v41 = vpack.c.bf16 %v714_v31, %v714_v31  ;;  %v730_v42 = vmax.f32 %v698_v32, 0.0  ;;  %v598_v45 = vpop.f32.mrf.mxu1  ;;  %v1081_v46 = vpop.f32.mrf.mxu0 }
  0xed   : > { %v712_v43 = vmax.f32 %v680_v33, 0.0  ;;  %v685_v44 = vadd.f32 %v1306_v24, %v646_v34  ;;  %888 = vst.msk [vmem:[%s1319_s17 + $0x50] sm:$0xf] %vm867_vm2, %v1039_v37  ;;  %v728_v47 = vmax.f32 %v696_v38, 0.0  ;;  %v660_v50 = vmul.f32 %v1301_v23, %v598_v45 }
  0xee   : > { %v701_v48 = vadd.f32 %v1306_v24, %v662_v39  ;;  %v683_v49 = vadd.f32 %v1306_v24, %v644_v40  ;;  %875 = vst.msk [vmem:[%s1319_s17 + $0x1c] sm:$0xf] %vm867_vm2, %v1026_v41  ;;  %v1042_v51 = vpack.c.bf16 %v730_v42, %v730_v42  ;;  %v647_v54 = vmul.f32 %v1081_v46, %v1301_v23  ;;  %v1097_v55 = vpop.f32.mrf.mxu1  ;;  %v537_v56 = vpop.f32.mrf.mxu0 }
  0xef   : > { %v1024_v52 = vpack.c.bf16 %v712_v43, %v712_v43  ;;  %v717_v53 = vmax.f32 %v685_v44, 0.0  ;;  %v1040_v57 = vpack.c.bf16 %v728_v47, %v728_v47  ;;  %v699_v60 = vadd.f32 %v1306_v24, %v660_v50 }
  0xf0   : > { %v733_v58 = vmax.f32 %v701_v48, 0.0  ;;  %v715_v59 = vmax.f32 %v683_v49, 0.0  ;;  %891 = vst.msk [vmem:[%s1319_s17 + $0x5c] sm:$0xf] %vm867_vm2, %v1042_v51  ;;  %v686_v62 = vadd.f32 %v1306_v24, %v647_v54  ;;  %v663_v63 = vmul.f32 %v1097_v55, %v1301_v23  ;;  %v601_v1 = vpop.f32.mrf.mxu1  ;;  %v1084_v4 = vpop.f32.mrf.mxu0 }
  0xf1   : > { %873 = vst.msk [vmem:[%s1319_s17 + $0x14] sm:$0xf] %vm867_vm2, %v1024_v52  ;;  %v1029_v61 = vpack.c.bf16 %v717_v53, %v717_v53  ;;  %v645_v0 = vmul.f32 %v1301_v23, %v537_v56  ;;  %889 = vst.msk [vmem:[%s1319_s17 + $0x54] sm:$0xf] %vm867_vm2, %v1040_v57  ;;  %v731_v7 = vmax.f32 %v699_v60, 0.0  ;;  %v661_v8 = vmul.f32 %v1301_v23, %v601_v1 }
  0xf2   : > { %v1045_v5 = vpack.c.bf16 %v733_v58, %v733_v58  ;;  %v1027_v6 = vpack.c.bf16 %v715_v59, %v715_v59  ;;  %v718_v9 = vmax.f32 %v686_v62, 0.0  ;;  %v702_v10 = vadd.f32 %v1306_v24, %v663_v63  ;;  %v1100_v13 = vpop.f32.mrf.mxu1  ;;  %v550_v14 = vpop.f32.mrf.mxu0 }
  0xf3   : > { %878 = vst.msk [vmem:[%s1319_s17 + $0x28] sm:$0xf] %vm867_vm2, %v1029_v61  ;;  %v684_v11 = vadd.f32 %v1306_v24, %v645_v0  ;;  %v650_v12 = vmul.f32 %v1084_v4, %v1301_v23  ;;  %v1043_v15 = vpack.c.bf16 %v731_v7, %v731_v7  ;;  %v700_v16 = vadd.f32 %v1306_v24, %v661_v8 }
  0xf4   : > { %894 = vst.msk [vmem:[%s1319_s17 + $0x68] sm:$0xf] %vm867_vm2, %v1045_v5  ;;  %876 = vst.msk [vmem:[%s1319_s17 + $0x20] sm:$0xf] %vm867_vm2, %v1027_v6  ;;  %v666_v17 = vmul.f32 %v1100_v13, %v1301_v23  ;;  %v648_v18 = vmul.f32 %v1301_v23, %v550_v14  ;;  %v1030_v19 = vpack.c.bf16 %v718_v9, %v718_v9  ;;  %v734_v20 = vmax.f32 %v702_v10, 0.0  ;;  %v614_v2 = vpop.f32.mrf.mxu1  ;;  %v1085_v3 = vpop.f32.mrf.mxu0 }
  0xf5   : > { %v716_v21 = vmax.f32 %v684_v11, 0.0  ;;  %v689_v22 = vadd.f32 %v1306_v24, %v650_v12  ;;  %892 = vst.msk [vmem:[%s1319_s17 + $0x60] sm:$0xf] %vm867_vm2, %v1043_v15  ;;  %v732_v25 = vmax.f32 %v700_v16, 0.0  ;;  %v664_v28 = vmul.f32 %v1301_v23, %v614_v2 }
  0xf6   : > { %v705_v26 = vadd.f32 %v1306_v24, %v666_v17  ;;  %v687_v27 = vadd.f32 %v1306_v24, %v648_v18  ;;  %879 = vst.msk [vmem:[%s1319_s17 + $0x2c] sm:$0xf] %vm867_vm2, %v1030_v19  ;;  %v1046_v29 = vpack.c.bf16 %v734_v20, %v734_v20  ;;  %v651_v32 = vmul.f32 %v1085_v3, %v1301_v23  ;;  %v1101_v33 = vpop.f32.mrf.mxu1  ;;  %v553_v34 = vpop.f32.mrf.mxu0 }
  0xf7   : > { %v1028_v30 = vpack.c.bf16 %v716_v21, %v716_v21  ;;  %v721_v31 = vmax.f32 %v689_v22, 0.0  ;;  %v1044_v35 = vpack.c.bf16 %v732_v25, %v732_v25  ;;  %v703_v38 = vadd.f32 %v1306_v24, %v664_v28 }
  0xf8   : > { %v737_v36 = vmax.f32 %v705_v26, 0.0  ;;  %v719_v37 = vmax.f32 %v687_v27, 0.0  ;;  %895 = vst.msk [vmem:[%s1319_s17 + $0x6c] sm:$0xf] %vm867_vm2, %v1046_v29  ;;  %v690_v40 = vadd.f32 %v1306_v24, %v651_v32  ;;  %v667_v41 = vmul.f32 %v1101_v33, %v1301_v23  ;;  %v617_v43 = vpop.f32.mrf.mxu1 }
  0xf9   : > { %877 = vst.msk [vmem:[%s1319_s17 + $0x24] sm:$0xf] %vm867_vm2, %v1028_v30  ;;  %v1033_v39 = vpack.c.bf16 %v721_v31, %v721_v31  ;;  %v649_v42 = vmul.f32 %v1301_v23, %v553_v34  ;;  %893 = vst.msk [vmem:[%s1319_s17 + $0x64] sm:$0xf] %vm867_vm2, %v1044_v35  ;;  %v735_v46 = vmax.f32 %v703_v38, 0.0  ;;  %v665_v47 = vmul.f32 %v1301_v23, %v617_v43 }
  0xfa   : > { %v1049_v44 = vpack.c.bf16 %v737_v36, %v737_v36  ;;  %v1031_v45 = vpack.c.bf16 %v719_v37, %v719_v37  ;;  %v722_v48 = vmax.f32 %v690_v40, 0.0  ;;  %v706_v49 = vadd.f32 %v1306_v24, %v667_v41 }
  0xfb   : > { %882 = vst.msk [vmem:[%s1319_s17 + $0x38] sm:$0xf] %vm867_vm2, %v1033_v39  ;;  %v688_v50 = vadd.f32 %v1306_v24, %v649_v42  ;;  %v1047_v51 = vpack.c.bf16 %v735_v46, %v735_v46  ;;  %v704_v52 = vadd.f32 %v1306_v24, %v665_v47 }
  0xfc   : > { %898 = vst.msk [vmem:[%s1319_s17 + $0x78] sm:$0xf] %vm867_vm2, %v1049_v44  ;;  %880 = vst.msk [vmem:[%s1319_s17 + $0x30] sm:$0xf] %vm867_vm2, %v1031_v45  ;;  %v1034_v53 = vpack.c.bf16 %v722_v48, %v722_v48  ;;  %v738_v54 = vmax.f32 %v706_v49, 0.0 }
  0xfd   : > { %v720_v23 = vmax.f32 %v688_v50, 0.0  ;;  %896 = vst.msk [vmem:[%s1319_s17 + $0x70] sm:$0xf] %vm867_vm2, %v1047_v51  ;;  %v736_v55 = vmax.f32 %v704_v52, 0.0 }
  0xfe   : > { %883 = vst.msk [vmem:[%s1319_s17 + $0x3c] sm:$0xf] %vm867_vm2, %v1034_v53  ;;  %v1050_v56 = vpack.c.bf16 %v738_v54, %v738_v54 }
  0xff   : > { %v1032_v57 = vpack.c.bf16 %v720_v23, %v720_v23  ;;  %v1048_v58 = vpack.c.bf16 %v736_v55, %v736_v55 }
 0x100   : > { %899 = vst.msk [vmem:[%s1319_s17 + $0x7c] sm:$0xf] %vm867_vm2, %v1050_v56 }
 0x101   : > { %881 = vst.msk [vmem:[%s1319_s17 + $0x34] sm:$0xf] %vm867_vm2, %v1032_v57  ;;  %897 = vst.msk [vmem:[%s1319_s17 + $0x74] sm:$0xf] %vm867_vm2, %v1048_v58 }
 0x102 PF: > { %s16_s21 = sadd.s32 1, %s1120_s21  }
 0x103   : > { %p13_p4 = scmp.ge.s32.totalorder %s16_s21, 4  }
 0x105   :  { %15 = sbr.rel (!%p13_p4) target bundleno = 1 (0x1), region = 74 }

// kernel: bottleneck_forward.5
= control target key start
LH: loop header
LB: loop body
LE: loop exit
PB: predicated region body
PF: predicated region fallthrough
CT: control target
= control target key end

     0   :  { %s712_s21 = smov 0   ;;  %s774_s0 = inlined_call_operand.vmem [shape: bf16[128,8], index: 0, kind: input, shape index: {}]   ;;  %s775_s1 = inlined_call_operand.vmem [shape: bf16[8,8], index: 1, kind: input, shape index: {}]   ;;  %s776_s2 = inlined_call_operand.vmem [shape: f32[128,4], index: 2, kind: input, shape index: {}]   ;;  %s777_s3 = inlined_call_operand.vmem [shape: f32[1,4], index: 3, kind: input, shape index: {}]   ;;  %s778_s4 = inlined_call_operand.vmem [shape: f32[1,4], index: 4, kind: input, shape index: {}]   ;;  %s779_s5 = inlined_call_operand.vmem [shape: bf16[4,8], index: 5, kind: input, shape index: {}]   ;;  %s780_s6 = inlined_call_operand.vmem [shape: f32[128,8], index: 6, kind: output, shape index: {}]  }
   0x1 LB: > { %s598_s22 = sadd.s32 4294967295, %s675_s21   ;;  %p602_p0 = scmp.ge.s32.totalorder %s675_s21, 1  ;;  %s675_s21 = sphi %s712_s21, %s16_s21  }
   0x2   : > { %p224_p1 = scmp.lt.s32.totalorder %s675_s21, 3 }
   0x4   : > { %p225_p2 = pnand %p602_p0, %p224_p1 }
   0x5   : > { %s603_s25 = sshll.u32 (!%p225_p2), %s598_s22, 3 }
   0x6   : > { %228 = sbr.rel (%p225_p2) target bundleno = 236 (0xec), region = 44  ;;  %p260_p3 = scmp.lt.s32.totalorder (!%p225_p2), %s603_s25, 15 }
   0xb   : > { %v286_v0 = vld [vmem:[%s775_s1] sm:$0xf]  ;;  %vm453_vm0 = vcmask 1043456   ;;  %vm351_vm1 = vcmask 1041408   ;;  %s782_s25 = smov (!%p260_p3, %s603_s25), 15  ;;  %vm440_vm2 = vcmask 64512  }
   0xc   : > { %656 = vmatprep.subr.msk.bf16.mxu1 %vm453_vm0, %v286_v0  ;;  %v455_v1 = vsel %vm453_vm0, %v286_v0, 0  ;;  %v337_v2 = vld [vmem:[%s779_s5] sm:$0x3]  ;;  %s604_s28 = sshll.u32 %s782_s25, 2  ;;  %s606_s29 = sshll.u32 %s782_s25, 3  ;;  %vm338_vm3 = vcmask 31744  }
   0xd   : > { %646 = vmatpush3.bf16.msra.mxu1 %v455_v1  ;;  %655 = vmatprep.subr.msk.bf16.mxu0 %vm351_vm1, %v337_v2  ;;  %v353_v3 = vsel %vm351_vm1, %v337_v2, 0  ;;  %s733_s8 = scalar_lea.vmem %s774_s0, %s604_s28  ;;  %s269_s11 = scalar_lea.vmem %s776_s2, %s606_s29  ;;  %v609_v4 = vld [vmem:[%s777_s3] ss:$0 sm:$0xff] }
   0xe   : > { %636 = vmatpush3.bf16.msra.mxu0 %v353_v3  ;;  %v665_v5 = vld [vmem:[%s733_s8] sm:$0xff]   ;;  %v666_v7 = vld [vmem:[%s733_s8 + $0x8] sm:$0xff]   ;;  %v289_v10 = vld [vmem:[%s269_s11 + $0x10] sm:$0xff]  ;;  %s275_s18 = scalar_lea.vmem %s780_s6, %s606_s29 }
   0xf   : > { %v610_v6 = vld [vmem:[%s778_s4] ss:$0 sm:$0xff]  ;;  %647 = vmatprep.mubr.msk.bf16.mxu1 %vm440_vm2, %v665_v5  ;;  %v288_v9 = vld [vmem:[%s269_s11 + $0x8] sm:$0xff]  ;;  %v290_v13 = vld [vmem:[%s269_s11 + $0x18] sm:$0xff]  ;;  %v304_v14 = vmul.f32 %v609_v4, %v289_v10 }
  0x10   : > { %v287_v8 = vld [vmem:[%s269_s11] sm:$0xff]  ;;  %648 = vmatmul.mubr.msk.bf16.vlgmr.msra.gmra.mxu1 %vm440_vm2, %v666_v7  ;;  %v303_v12 = vmul.f32 %v609_v4, %v288_v9  ;;  %v305_v15 = vmul.f32 %v609_v4, %v290_v13  ;;  %v667_v16 = vld [vmem:[%s733_s8 + $0x10] sm:$0xff]   ;;  %v292_v21 = vld [vmem:[%s269_s11 + $0x28] sm:$0xff] }
  0x11   : > { %v302_v11 = vmul.f32 %v609_v4, %v287_v8  ;;  %v319_v19 = vadd.f32 %v610_v6, %v304_v14  ;;  %v291_v20 = vld [vmem:[%s269_s11 + $0x20] sm:$0xff]  ;;  %651 = vmatprep.mubr.msk.bf16.mxu1 %vm440_vm2, %v667_v16  ;;  %v307_v24 = vmul.f32 %v609_v4, %v292_v21  ;;  %v293_v25 = vld [vmem:[%s269_s11 + $0x30] sm:$0xff]  ;;  %v294_v26 = vld [vmem:[%s269_s11 + $0x38] sm:$0xff] }
  0x12   : > { %v318_v18 = vadd.f32 %v610_v6, %v303_v12  ;;  %v320_v22 = vadd.f32 %v610_v6, %v305_v15  ;;  %v306_v23 = vmul.f32 %v609_v4, %v291_v20  ;;  %v668_v30 = vld [vmem:[%s733_s8 + $0x18] sm:$0xff]   ;;  %v308_v31 = vmul.f32 %v609_v4, %v293_v25 }
  0x13   : > { %v317_v17 = vadd.f32 %v610_v6, %v302_v11  ;;  %v327_v29 = vmax.f32 %v319_v19, 0.0  ;;  %v322_v34 = vadd.f32 %v610_v6, %v307_v24  ;;  %v309_v35 = vmul.f32 %v609_v4, %v294_v26 }
  0x14   : > { %v326_v28 = vmax.f32 %v318_v18, 0.0  ;;  %v328_v32 = vmax.f32 %v320_v22, 0.0  ;;  %v321_v33 = vadd.f32 %v610_v6, %v306_v23  ;;  %v323_v37 = vadd.f32 %v610_v6, %v308_v31 }
  0x15   : > { %v325_v27 = vmax.f32 %v317_v17, 0.0  ;;  %v330_v40 = vmax.f32 %v322_v34, 0.0  ;;  %v324_v41 = vadd.f32 %v610_v6, %v309_v35 }
  0x16   : > { %v334_v38 = vpack.c.bf16 %v328_v32, %v327_v29  ;;  %v329_v39 = vmax.f32 %v321_v33, 0.0  ;;  %v331_v43 = vmax.f32 %v323_v37, 0.0 }
  0x17   : > { %v333_v36 = vpack.c.bf16 %v326_v28, %v325_v27  ;;  %v332_v44 = vmax.f32 %v324_v41, 0.0 }
  0x18   : > { %652 = vmatmul.mubr.msk.bf16.gmra.mxu1 %vm440_vm2, %v668_v30  ;;  %v335_v42 = vpack.c.bf16 %v330_v40, %v329_v39 }
  0x19   : > { %637 = vmatprep.mubr.msk.bf16.mxu0 %vm338_vm3, %v333_v36  ;;  %v336_v45 = vpack.c.bf16 %v332_v44, %v331_v43 }
  0x1a   : > { %638 = vmatmul.mubr.msk.bf16.vlgmr.msra.gmra.mxu0 %vm338_vm3, %v334_v38 }
  0x1b   : > { %641 = vmatprep.mubr.msk.bf16.mxu0 %vm338_vm3, %v335_v42 }
  0x22   : > { %642 = vmatmul.mubr.msk.bf16.gmra.mxu0 %vm338_vm3, %v336_v45 }
  0xd0   : > { %v649_v46 = vpop.f32.mrf.mxu1 }
  0xd2   : > { %v491_v47 = vpop.f32.mrf.mxu1 }
  0xd4   : > { %v650_v48 = vpop.f32.mrf.mxu1 }
  0xd6   : > { %v494_v49 = vpop.f32.mrf.mxu1 }
  0xd8   : > { %v653_v53 = vpop.f32.mrf.mxu1 }
  0xda   : > { %v639_v50 = vpop.f32.mrf.mxu0  ;;  %v507_v57 = vpop.f32.mrf.mxu1 }
  0xdb   : > { %v500_v51 = vadd.f32 %v649_v46, %v639_v50 }
  0xdc   : > { %v389_v52 = vpop.f32.mrf.mxu0  ;;  %v654_v62 = vpop.f32.mrf.mxu1 }
  0xdd   : > { %524 = vst.msk [vmem:[%s275_s18 + $0x10] sm:$0xff] %vm440_vm2, %v500_v51  ;;  %v492_v54 = vadd.f32 %v491_v47, %v389_v52 }
  0xde   : > { %v640_v55 = vpop.f32.mrf.mxu0  ;;  %v510_v3 = vpop.f32.mrf.mxu1 }
  0xdf   : > { %522 = vst.msk [vmem:[%s275_s18] sm:$0xff] %vm440_vm2, %v492_v54  ;;  %v503_v56 = vadd.f32 %v650_v48, %v640_v55 }
  0xe0   : > { %v392_v58 = vpop.f32.mrf.mxu0 }
  0xe1   : > { %525 = vst.msk [vmem:[%s275_s18 + $0x18] sm:$0xff] %vm440_vm2, %v503_v56  ;;  %v495_v59 = vadd.f32 %v494_v49, %v392_v58 }
  0xe2   : > { %v643_v60 = vpop.f32.mrf.mxu0 }
  0xe3   : > { %523 = vst.msk [vmem:[%s275_s18 + $0x8] sm:$0xff] %vm440_vm2, %v495_v59  ;;  %v516_v61 = vadd.f32 %v653_v53, %v643_v60 }
  0xe4   : > { %v405_v63 = vpop.f32.mrf.mxu0 }
  0xe5   : > { %528 = vst.msk [vmem:[%s275_s18 + $0x30] sm:$0xff] %vm440_vm2, %v516_v61  ;;  %v508_v0 = vadd.f32 %v507_v57, %v405_v63 }
  0xe6   : > { %v644_v1 = vpop.f32.mrf.mxu0 }
  0xe7   : > { %526 = vst.msk [vmem:[%s275_s18 + $0x20] sm:$0xff] %vm440_vm2, %v508_v0  ;;  %v519_v2 = vadd.f32 %v654_v62, %v644_v1 }
  0xe8   : > { %v408_v4 = vpop.f32.mrf.mxu0 }
  0xe9   : > { %529 = vst.msk [vmem:[%s275_s18 + $0x38] sm:$0xff] %vm440_vm2, %v519_v2  ;;  %v511_v5 = vadd.f32 %v510_v3, %v408_v4 }
  0xeb   : > { %527 = vst.msk [vmem:[%s275_s18 + $0x28] sm:$0xff] %vm440_vm2, %v511_v5 }
  0xec PF: > { %s16_s21 = sadd.s32 1, %s675_s21  }
  0xed   : > { %p13_p4 = scmp.ge.s32.totalorder %s16_s21, 4  }
  0xef   :  { %15 = sbr.rel (!%p13_p4) target bundleno = 1 (0x1), region = 77 }

// kernel: bottleneck_forward.4
= control target key start
LH: loop header
LB: loop body
LE: loop exit
PB: predicated region body
PF: predicated region fallthrough
CT: control target
= control target key end

     0   :  { %s1139_s15 = smov 0   ;;  %s1141_s16 = smov 0   ;;  %s1309_s0 = inlined_call_operand.vmem [shape: bf16[2,4,9,9,8], index: 0, kind: input, shape index: {}]   ;;  %s1310_s1 = inlined_call_operand.vmem [shape: bf16[72,8], index: 1, kind: input, shape index: {}]   ;;  %s1311_s2 = inlined_call_operand.vmem [shape: f32[1,8], index: 2, kind: input, shape index: {}]   ;;  %s1312_s3 = inlined_call_operand.vmem [shape: f32[1,8], index: 3, kind: input, shape index: {}]   ;;  %s1313_s4 = inlined_call_operand.vmem [shape: bf16[2,8,8,8], index: 4, kind: output, shape index: {}]  }
   0x1   :  { %s1143_s17 = smov 0   ;;  %s1145_s18 = smov 0  }
   0x2   :  { %s1147_s19 = smov 0  }
   0x3 LB: > { %s23_s20 = sadd.s32 1, %s1096_s17  ;;  %s26_s21 = sadd.s32 1, %s1100_s18  ;;  %s1104_s19 = sphi %s1147_s19, %s14_s19   ;;  %s1100_s18 = sphi %s1145_s18, %s1317_s18   ;;  %s1096_s17 = sphi %s1143_s17, %s1316_s17   ;;  %s1092_s16 = sphi %s1141_s16, %s1315_s16   ;;  %s1088_s15 = sphi %s1139_s15, %s1314_s15  }
   0x4   : > { %p24_p0 = scmp.ge.s32.totalorder %s23_s20, 2  ;;  %p858_p1 = scmp.ge.s32.totalorder %s1104_s19, 1 }
   0x5   : > { %p176_p2 = scmp.lt.s32.totalorder %s1104_s19, 5 }
   0x6   : > { %s1319_s20 = smov (%p24_p0, %s23_s20), 0  ;;  %s1321_s21 = smov (!%p24_p0, %s26_s21), %s1100_s18 }
   0x7   : > { %p177_p3 = pnand %p858_p1, %p176_p2  ;;  %p28_p4 = scmp.ge.s32.totalorder %s1321_s21, 2 }
   0x8   : > { %p206_p5 = scmp.lt.s32.totalorder (!%p177_p3), %s1092_s16, 1  ;;  %s951_s23 = sshll.u32 (!%p177_p3), %s1088_s15, 5 }
   0x9   : > { %s1323_s21 = smov (%p28_p4, %s1321_s21), 0  ;;  %180 = sbr.rel (%p177_p3) target bundleno = 406 (0x196), region = 36 }
   0xa   : > { %s1106_s28 = smov (!%p177_p3), 8   ;;  %s1107_s29 = smov (!%p177_p3), 24  }
   0xb   : > { %s1108_s30 = smov (!%p177_p3), 16   ;;  %s1109_s5 = smov (!%p177_p3), 32  }
   0xc   : > { %s1110_s8 = smov (!%p177_p3), 40   ;;  %s1111_s13 = smov (!%p177_p3), 48  }
   0xd   : > { %s1112_s25 = smov (!%p177_p3), 56  }
   0xe   : > { %s1325_s16 = smov (!%p206_p5, %s1092_s16), 1  ;;  %v1061_v63 = vld [vmem:[%s1310_s1 + $0x20] ss:$0 sps:$4 sm:$0xff]   ;;  %vm659_vm0 = vcmask 1043456   ;;  %vm530_vm1 = vcmask 64512   ;;  %vm543_vm2 = vcmask 130048  }
   0xf   : > { %s980_s22 = smul.u32 288, %s1325_s16  ;;  %979 = vmatprep.subr.msk.bf16.mxu0 %vm659_vm0, %v1061_v63  ;;  %vm552_vm3 = vcmask 195584   ;;  %vm561_vm4 = vcmask 261120   ;;  %vm570_vm5 = vcmask 326656   ;;  %vm579_vm6 = vcmask 392192  }
  0x10   : > { %vm588_vm7 = vcmask 457728   ;;  %vm597_vm8 = vcmask 523264   ;;  %vm652_vm9 = vcmask 588800   ;;  %vm742_vm10 = vcmask 60416  }
  0x11   : > { %s210_s26 = scalar_lea.vmem %s1309_s0, %s980_s22 }
  0x12   : > { %s1178_s27 = scalar_lea.vmem %s210_s26, %s951_s23  ;;  %s1113_s26 = smov 64  }
  0x13   : > { %v1029_v0 = vld [vmem:[%s1178_s27 + $0x58] ss:$0 sps:$4 sm:$0xff]   ;;  %v1030_v1 = vld [vmem:[%s1178_s27 + $0x48] ss:$0 sps:$4 sm:$0xff]   ;;  %v1031_v2 = vld [vmem:[%s1178_s27 + $0x60] ss:$0 sps:$4 sm:$0xff]  }
  0x14   : > { %294 = vrot.lane.b32.xlu1 %v1029_v0, %s1106_s28  ;;  %290 = vrot.lane.b32.xlu0 %v1030_v1, %s1106_s28  ;;  %v1032_v3 = vld [vmem:[%s1178_s27 + $0x50] ss:$0 sps:$4 sm:$0xff]   ;;  %v875_v4 = vld [vmem:[%s1178_s27 + $0x98] sm:$0xf] }
  0x15   : > { %v874_v5 = vld [vmem:[%s1178_s27 + $0x90] sm:$0xf]  ;;  %v1187_v6 = vld [vmem:[%s1178_s27 + $0x8] sm:$0xf]  ;;  %v238_v7 = vld [vmem:[%s1178_s27 + $0xc] sm:$0x1]  ;;  %v914_v13 = vcombine.low %v875_v4, %v875_v4 }
  0x16   : > { %v1191_v8 = vld [vmem:[%s1178_s27] sm:$0xf]  ;;  %v910_v9 = vcombine.low %v1187_v6, %v238_v7  ;;  %v237_v10 = vld [vmem:[%s1178_s27 + $0x4] sm:$0x1]  ;;  %v1196_v11 = vld [vmem:[%s1178_s27 + $0x18] sm:$0xf]  ;;  %v913_v18 = vcombine.low %v874_v5, %v874_v5 }
  0x17   : > { %v240_v12 = vld [vmem:[%s1178_s27 + $0x1c] sm:$0x1]  ;;  %v909_v14 = vcombine.low %v1191_v8, %v237_v10  ;;  %v1202_v16 = vld [vmem:[%s1178_s27 + $0x10] sm:$0xf]  ;;  %v239_v17 = vld [vmem:[%s1178_s27 + $0x14] sm:$0x1] }
  0x18   : > { %296 = vrot.lane.b32.xlu1 %v1031_v2, %s1106_s28  ;;  %v912_v15 = vcombine.low %v1196_v11, %v240_v12  ;;  %292 = vrot.lane.b32.xlu0 %v1032_v3, %s1106_s28  ;;  %v326_v19 = vshrl.u32 %v910_v9, 16  ;;  %v328_v20 = vshll.u32 %v910_v9, 16  ;;  %v911_v21 = vcombine.low %v1202_v16, %v239_v17  ;;  %v885_v35 = vld [vmem:[%s1178_s27 + $0x9c] sm:$0x1]  ;;  %v877_v37 = vld [vmem:[%s1178_s27 + $0xa8] sm:$0xf] }
  0x19   : > { %v319_v22 = vshrl.u32 %v909_v14, 16  ;;  %v321_v23 = vshll.u32 %v909_v14, 16  ;;  %v884_v38 = vld [vmem:[%s1178_s27 + $0x94] sm:$0x1]  ;;  %v876_v39 = vld [vmem:[%s1178_s27 + $0xa0] sm:$0xf]  ;;  %v922_v40 = vcombine.low %v875_v4, %v885_v35  ;;  %v916_v41 = vcombine.low %v877_v37, %v877_v37 }
  0x1a   : > { %v342_v24 = vshll.u32 %v912_v15, 16  ;;  %v330_v25 = vrot.slane %v328_v20, 1  ;;  %v335_v26 = vshll.u32 %v911_v21, 16  ;;  %v340_v28 = vshrl.u32 %v912_v15, 16  ;;  %v887_v43 = vld [vmem:[%s1178_s27 + $0xac] sm:$0x1] }
  0x1b   : > { %v323_v27 = vrot.slane %v321_v23, 1  ;;  %v333_v31 = vshrl.u32 %v911_v21, 16  ;;  %v921_v42 = vcombine.low %v874_v5, %v884_v38  ;;  %v915_v44 = vcombine.low %v876_v39, %v876_v39  ;;  %v886_v45 = vld [vmem:[%s1178_s27 + $0xa4] sm:$0x1]  ;;  %v1045_v47 = vld [vmem:[%s1178_s27 + $0xe0] ss:$0 sps:$4 sm:$0xff]  }
  0x1c   : > { %368 = vrot.lane.b32.xlu1 %v914_v13, %s1107_s29  ;;  %v344_v29 = vrot.slane %v342_v24, 1  ;;  %366 = vrot.lane.b32.xlu0 %v913_v18, %s1107_s29  ;;  %v331_v30 = vor.u32 %v330_v25, %v326_v19  ;;  %v337_v32 = vrot.slane %v335_v26, 1  ;;  %v924_v46 = vcombine.low %v877_v37, %v887_v43  ;;  %v1046_v50 = vld [vmem:[%s1178_s27 + $0xd8] ss:$0 sps:$4 sm:$0xff]   ;;  %v1047_v52 = vld [vmem:[%s1178_s27 + $0xf0] ss:$0 sps:$4 sm:$0xff]  }
  0x1d   : > { %v324_v33 = vor.u32 %v323_v27, %v319_v22  ;;  %v416_v48 = vshll.u32 %v922_v40, 16  ;;  %v923_v49 = vcombine.low %v876_v39, %v886_v45  ;;  %v409_v51 = vshll.u32 %v921_v42, 16  ;;  %v1048_v56 = vld [vmem:[%s1178_s27 + $0xe8] ss:$0 sps:$4 sm:$0xff]   ;;  %v1062_v5 = vld [vmem:[%s1310_s1 + $0x18] sm:$0xff]   ;;  %v1063_v13 = vld [vmem:[%s1310_s1 + $0x10] sm:$0xff]  }
  0x1e   : > { %v345_v34 = vor.u32 %v344_v29, %v340_v28  ;;  %v338_v36 = vor.u32 %v337_v32, %v333_v31  ;;  %v414_v53 = vshrl.u32 %v922_v40, 16  ;;  %v430_v55 = vshll.u32 %v924_v46, 16  ;;  %v891_v9 = vld [vmem:[%s1178_s27 + $0x10] sm:$0xf]  ;;  %v890_v10 = vld [vmem:[%s1178_s27 + $0x8] sm:$0xf] }
  0x1f   : > { %v418_v54 = vrot.slane %v416_v48, 1  ;;  %v407_v57 = vshrl.u32 %v921_v42, 16  ;;  %v411_v58 = vrot.slane %v409_v51, 1  ;;  %v423_v59 = vshll.u32 %v923_v49, 16  ;;  %v902_v14 = vld [vmem:[%s1178_s27 + $0x14] sm:$0x1] }
  0x20   : > { %348 = vrot.lane.b32.xlu1 %v331_v30, %s1108_s30  ;;  %346 = vrot.lane.b32.xlu0 %v324_v33, %s1108_s30  ;;  %v428_v61 = vshrl.u32 %v924_v46, 16  ;;  %v432_v62 = vrot.slane %v430_v55, 1  ;;  %v421_v1 = vshrl.u32 %v923_v49, 16  ;;  %v661_v3 = vsel %vm659_vm0, %v1061_v63, 0  ;;  %v893_v17 = vld [vmem:[%s1178_s27 + $0x20] sm:$0xf] }
  0x21   : > { %v419_v60 = vor.u32 %v418_v54, %v414_v53  ;;  %v412_v0 = vor.u32 %v411_v58, %v407_v57  ;;  %v425_v2 = vrot.slane %v423_v59, 1  ;;  %966 = vmatpush3.bf16.msra.mxu0 %v661_v3  ;;  %v926_v12 = vcombine.low %v891_v9, %v891_v9  ;;  %v901_v18 = vld [vmem:[%s1178_s27 + $0xc] sm:$0x1]  ;;  %v892_v19 = vld [vmem:[%s1178_s27 + $0x18] sm:$0xf]  ;;  %v1065_v30 = vld [vmem:[%s1310_s1] sm:$0xff]  }
  0x22   : > { %v433_v4 = vor.u32 %v432_v62, %v428_v61  ;;  %967 = vmatprep.subr.bf16.mxu0 %v1062_v5  ;;  %v925_v15 = vcombine.low %v890_v10, %v890_v10  ;;  %v934_v20 = vcombine.low %v891_v9, %v902_v14  ;;  %v928_v21 = vcombine.low %v893_v17, %v893_v17  ;;  %v1064_v22 = vld [vmem:[%s1310_s1 + $0x8] sm:$0xff]   ;;  %v904_v24 = vld [vmem:[%s1178_s27 + $0x24] sm:$0x1]  ;;  %v903_v26 = vld [vmem:[%s1178_s27 + $0x1c] sm:$0x1]  ;;  %s861_s28 = sshll.u32 %s1325_s16, 3 }
  0x23   : > { %v426_v7 = vor.u32 %v425_v2, %v421_v1  ;;  %v933_v23 = vcombine.low %v890_v10, %v901_v18  ;;  %v927_v25 = vcombine.low %v892_v19, %v892_v19  ;;  %v936_v27 = vcombine.low %v893_v17, %v904_v24  ;;  %v1057_v28 = vld [vmem:[%s1178_s27 + $0x58] ss:$0 sps:$4 sm:$0xff]   ;;  %v1058_v32 = vld [vmem:[%s1178_s27 + $0x50] ss:$0 sps:$4 sm:$0xff]   ;;  %v1060_v38 = vld [vmem:[%s1178_s27 + $0x60] ss:$0 sps:$4 sm:$0xff]  }
  0x24   : > { %352 = vrot.lane.b32.xlu1 %v345_v34, %s1108_s30  ;;  %350 = vrot.lane.b32.xlu0 %v338_v36, %s1108_s30  ;;  %v504_v29 = vshll.u32 %v934_v20, 16  ;;  %v935_v31 = vcombine.low %v892_v19, %v903_v26  ;;  %v1059_v34 = vld [vmem:[%s1178_s27 + $0x68] ss:$0 sps:$4 sm:$0xff]   ;;  %v502_v35 = vshrl.u32 %v934_v20, 16  ;;  %s860_s27 = sshll.u32 %s1088_s15, 2 }
  0x25   : > { %968 = vmatpush3.bf16.msra.mxu0 %v1062_v5  ;;  %v497_v33 = vshll.u32 %v933_v23, 16  ;;  %v518_v37 = vshll.u32 %v936_v27, 16  ;;  %v495_v39 = vshrl.u32 %v933_v23, 16  ;;  %v516_v43 = vshrl.u32 %v936_v27, 16  ;;  %p214_p6 = scmp.lt.s32.totalorder %s860_s27, 7 }
  0x26   : > { %969 = vmatprep.subr.bf16.mxu0 %v1063_v13  ;;  %v506_v36 = vrot.slane %v504_v29, 1  ;;  %v509_v46 = vshrl.u32 %v935_v31, 16 }
  0x27   : > { %v499_v40 = vrot.slane %v497_v33, 1  ;;  %s1327_s27 = smov (!%p214_p6, %s860_s27), 7 }
  0x28   : > { %372 = vrot.lane.b32.xlu1 %v916_v41, %s1107_s29  ;;  %370 = vrot.lane.b32.xlu0 %v915_v44, %s1107_s29  ;;  %v511_v41 = vshll.u32 %v935_v31, 16  ;;  %v507_v42 = vor.u32 %v506_v36, %v502_v35  ;;  %v520_v44 = vrot.slane %v518_v37, 1 }
  0x29   : > { %970 = vmatpush3.bf16.msra.mxu0 %v1063_v13  ;;  %v500_v45 = vor.u32 %v499_v40, %v495_v39 }
  0x2a   : > { %971 = vmatprep.subr.bf16.mxu0 %v1064_v22  ;;  %v521_v48 = vor.u32 %v520_v44, %v516_v43 }
  0x2c   : > { %388 = vrot.lane.b32.xlu1 %v1045_v47, %s1109_s5  ;;  %386 = vrot.lane.b32.xlu0 %v1046_v50, %s1109_s5  ;;  %v513_v47 = vrot.slane %v511_v41, 1 }
  0x2d   : > { %972 = vmatpush3.bf16.msra.mxu0 %v1064_v22 }
  0x2e   : > { %973 = vmatprep.subr.bf16.mxu0 %v1065_v30  ;;  %v514_v49 = vor.u32 %v513_v47, %v509_v46 }
  0x30   : > { %392 = vrot.lane.b32.xlu1 %v1047_v52, %s1109_s5  ;;  %390 = vrot.lane.b32.xlu0 %v1048_v56, %s1109_s5  ;;  %s217_s5 = sadd.s32 %s861_s28, %s1327_s27 }
  0x31   : > { %974 = vmatpush3.bf16.msra.mxu0 %v1065_v30 }
  0x34   : > { %436 = vrot.lane.b32.xlu1 %v419_v60, %s1110_s8  ;;  %434 = vrot.lane.b32.xlu0 %v412_v0, %s1110_s8 }
  0x38   : > { %440 = vrot.lane.b32.xlu1 %v433_v4, %s1110_s8  ;;  %438 = vrot.lane.b32.xlu0 %v426_v7, %s1110_s8  ;;  %s862_s8 = sshll.u32 %s217_s5, 2 }
  0x39   : > { %s219_s9 = scalar_lea.vmem %s1313_s4, %s862_s8 }
  0x3c   : > { %456 = vrot.lane.b32.xlu1 %v926_v12, %s1111_s13  ;;  %454 = vrot.lane.b32.xlu0 %v925_v15, %s1111_s13 }
  0x40   : > { %460 = vrot.lane.b32.xlu1 %v928_v21, %s1111_s13  ;;  %458 = vrot.lane.b32.xlu0 %v927_v25, %s1111_s13 }
  0x44   : > { %476 = vrot.lane.b32.xlu1 %v1057_v28, %s1112_s25  ;;  %474 = vrot.lane.b32.xlu0 %v1058_v32, %s1112_s25 }
  0x48   : > { %480 = vrot.lane.b32.xlu1 %v1059_v34, %s1112_s25  ;;  %478 = vrot.lane.b32.xlu0 %v1060_v38, %s1112_s25 }
  0x4c   : > { %524 = vrot.lane.b32.xlu1 %v507_v42, %s1113_s26  ;;  %522 = vrot.lane.b32.xlu0 %v500_v45, %s1113_s26 }
  0x50   : > { %528 = vrot.lane.b32.xlu1 %v521_v48, %s1113_s26  ;;  %526 = vrot.lane.b32.xlu0 %v514_v49, %s1113_s26 }
  0x86   : > { %v295_v50 = vpop.permute.xlu1 %294  ;;  %v291_v51 = vpop.permute.xlu0 %290 }
  0x87   : > { %v533_v15 = vsel %vm530_vm1, %v1191_v8, %v291_v51  ;;  %v539_v26 = vsel %vm530_vm1, %v1202_v16, %v295_v50 }
  0x8a   : > { %v297_v52 = vpop.permute.xlu1 %296  ;;  %v293_v53 = vpop.permute.xlu0 %292 }
  0x8b   : > { %v536_v13 = vsel %vm530_vm1, %v1187_v6, %v293_v53  ;;  %v542_v8 = vsel %vm530_vm1, %v1196_v11, %v297_v52  ;;  %v946_v52 = vld [vmem:[%s1311_s2] ss:$0 sm:$0xff] }
  0x8e   : > { %v369_v54 = vpop.permute.xlu1 %368  ;;  %v367_v55 = vpop.permute.xlu0 %366 }
  0x92   : > { %v349_v56 = vpop.permute.xlu1 %348  ;;  %v347_v57 = vpop.permute.xlu0 %346 }
  0x93   : > { %v547_v17 = vsel %vm543_vm2, %v536_v13, %v349_v56  ;;  %v545_v19 = vsel %vm543_vm2, %v533_v15, %v347_v57 }
  0x94   : > { %v556_v20 = vsel %vm552_vm3, %v547_v17, %v369_v54  ;;  %v554_v6 = vsel %vm552_vm3, %v545_v19, %v367_v55  ;;  %v947_v54 = vld [vmem:[%s1312_s3] ss:$0 sm:$0xff] }
  0x96   : > { %v353_v58 = vpop.permute.xlu1 %352  ;;  %v351_v59 = vpop.permute.xlu0 %350 }
  0x97   : > { %v551_v27 = vsel %vm543_vm2, %v542_v8, %v353_v58  ;;  %v549_v30 = vsel %vm543_vm2, %v539_v26, %v351_v59 }
  0x9a   : > { %v373_v60 = vpop.permute.xlu1 %372  ;;  %v371_v61 = vpop.permute.xlu0 %370 }
  0x9b   : > { %v560_v31 = vsel %vm552_vm3, %v551_v27, %v373_v60  ;;  %v558_v34 = vsel %vm552_vm3, %v549_v30, %v371_v61 }
  0x9e   : > { %v389_v62 = vpop.permute.xlu1 %388  ;;  %v387_v63 = vpop.permute.xlu0 %386 }
  0x9f   : > { %v565_v22 = vsel %vm561_vm4, %v556_v20, %v389_v62  ;;  %v563_v24 = vsel %vm561_vm4, %v554_v6, %v387_v63 }
  0xa2   : > { %v393_v0 = vpop.permute.xlu1 %392  ;;  %v391_v1 = vpop.permute.xlu0 %390 }
  0xa3   : > { %v569_v35 = vsel %vm561_vm4, %v560_v31, %v393_v0  ;;  %v567_v38 = vsel %vm561_vm4, %v558_v34, %v391_v1 }
  0xa6   : > { %v437_v2 = vpop.permute.xlu1 %436  ;;  %v435_v3 = vpop.permute.xlu0 %434 }
  0xa7   : > { %v574_v25 = vsel %vm570_vm5, %v565_v22, %v437_v2  ;;  %v572_v28 = vsel %vm570_vm5, %v563_v24, %v435_v3 }
  0xaa   : > { %v441_v4 = vpop.permute.xlu1 %440  ;;  %v439_v5 = vpop.permute.xlu0 %438 }
  0xab   : > { %v578_v39 = vsel %vm570_vm5, %v569_v35, %v441_v4  ;;  %v576_v41 = vsel %vm570_vm5, %v567_v38, %v439_v5 }
  0xae   : > { %v457_v7 = vpop.permute.xlu1 %456  ;;  %v455_v9 = vpop.permute.xlu0 %454 }
  0xaf   : > { %v583_v29 = vsel %vm579_vm6, %v574_v25, %v457_v7  ;;  %v581_v11 = vsel %vm579_vm6, %v572_v28, %v455_v9 }
  0xb2   : > { %v461_v10 = vpop.permute.xlu1 %460  ;;  %v459_v12 = vpop.permute.xlu0 %458 }
  0xb3   : > { %v587_v42 = vsel %vm579_vm6, %v578_v39, %v461_v10  ;;  %v585_v44 = vsel %vm579_vm6, %v576_v41, %v459_v12 }
  0xb6   : > { %v477_v14 = vpop.permute.xlu1 %476  ;;  %v475_v18 = vpop.permute.xlu0 %474 }
  0xb7   : > { %v592_v32 = vsel %vm588_vm7, %v583_v29, %v477_v14  ;;  %v590_v16 = vsel %vm588_vm7, %v581_v11, %v475_v18 }
  0xba   : > { %v481_v21 = vpop.permute.xlu1 %480  ;;  %v479_v23 = vpop.permute.xlu0 %478 }
  0xbb   : > { %v596_v45 = vsel %vm588_vm7, %v587_v42, %v481_v21  ;;  %v594_v47 = vsel %vm588_vm7, %v585_v44, %v479_v23 }
  0xbe   : > { %v525_v33 = vpop.permute.xlu1 %524  ;;  %v523_v37 = vpop.permute.xlu0 %522 }
  0xbf   : > { %v601_v36 = vsel %vm597_vm8, %v592_v32, %v525_v33  ;;  %v599_v40 = vsel %vm597_vm8, %v590_v16, %v523_v37 }
  0xc0   : > { %v937_v43 = vcombine.low %v599_v40, %v601_v36 }
  0xc2   : > { %v529_v46 = vpop.permute.xlu1 %528  ;;  %975 = vmatprep.mubr.msk.bf16.mxu0 %vm652_vm9, %v937_v43  ;;  %v527_v49 = vpop.permute.xlu0 %526 }
  0xc3   : > { %v605_v48 = vsel %vm597_vm8, %v596_v45, %v529_v46  ;;  %v603_v50 = vsel %vm597_vm8, %v594_v47, %v527_v49 }
  0xc4   : > { %v938_v51 = vcombine.low %v603_v50, %v605_v48 }
  0xc6   : > { %976 = vmatmul.mubr.msk.bf16.vlgmr.msra.gmra.mxu0 %vm652_vm9, %v938_v51 }
 0x186   : > { %v977_v53 = vpop.f32.mrf.mxu0 }
 0x187   : > { %v721_v55 = vmul.f32 %v977_v53, %v946_v52 }
 0x188   : > { %v697_v56 = vpop.f32.mrf.mxu0 }
 0x189   : > { %v732_v57 = vadd.f32 %v947_v54, %v721_v55  ;;  %v719_v58 = vmul.f32 %v946_v52, %v697_v56 }
 0x18a   : > { %v978_v59 = vpop.f32.mrf.mxu0 }
 0x18b   : > { %v736_v60 = vmax.f32 %v732_v57, 0.0  ;;  %v730_v61 = vadd.f32 %v947_v54, %v719_v58  ;;  %v722_v62 = vmul.f32 %v978_v59, %v946_v52 }
 0x18c   : > { %v700_v63 = vpop.f32.mrf.mxu0 }
 0x18d   : > { %v740_v0 = vpack.c.bf16 %v736_v60, %v736_v60  ;;  %v734_v1 = vmax.f32 %v730_v61, 0.0  ;;  %v733_v2 = vadd.f32 %v947_v54, %v722_v62  ;;  %v720_v3 = vmul.f32 %v946_v52, %v700_v63 }
 0x18f   : > { %745 = vst.msk [vmem:[%s219_s9 + $0x8] sm:$0xf] %vm742_vm10, %v740_v0  ;;  %v738_v4 = vpack.c.bf16 %v734_v1, %v734_v1  ;;  %v737_v5 = vmax.f32 %v733_v2, 0.0  ;;  %v731_v7 = vadd.f32 %v947_v54, %v720_v3 }
 0x191   : > { %743 = vst.msk [vmem:[%s219_s9] sm:$0xf] %vm742_vm10, %v738_v4  ;;  %v741_v9 = vpack.c.bf16 %v737_v5, %v737_v5  ;;  %v735_v10 = vmax.f32 %v731_v7, 0.0 }
 0x193   : > { %746 = vst.msk [vmem:[%s219_s9 + $0xc] sm:$0xf] %vm742_vm10, %v741_v9  ;;  %v739_v12 = vpack.c.bf16 %v735_v10, %v735_v10 }
 0x195   : > { %744 = vst.msk [vmem:[%s219_s9 + $0x4] sm:$0xf] %vm742_vm10, %v739_v12 }
 0x196 PF: > { %s14_s19 = sadd.s32 1, %s1104_s19   ;;  %s1314_s15 = smov %s1096_s17 }
 0x197   : > { %p11_p7 = scmp.ge.s32.totalorder %s14_s19, 6   ;;  %s1315_s16 = smov %s1100_s18 }
 0x198   : > { %s1316_s17 = smov %s1319_s20  ;;  %s1317_s18 = smov %s1323_s21 }
 0x199   :  { %13 = sbr.rel (!%p11_p7) target bundleno = 3 (0x3), region = 72 }

</bundles_post_ra>
